<compile_context>
chip_gen: v7x
topology: tpu7x:2x2x1
jax: 0.10.0
libtpu: 0.0.40
codegen_flags: <defaults>
</compile_context>

<pallas_src>
import functools

import jax
import jax.numpy as jnp
from jax import lax
from jax.experimental import pallas as pl
from jax.experimental.pallas import tpu as pltpu


def _recip(v, approx):
    # pl.reciprocal(approx=True) uses the EUP slot on TPU; on non-TPU backends
    # (interpret/CPU correctness runs) plain division is used.
    if approx:
        return pl.reciprocal(v, approx=True)
    return 1.0 / v


def _dual_attention_kernel(gam_ref,    # scalar-prefetch: (1,) [gamma_ca] in SMEM
                           x_ref,      # (1, C, N) input slab (compute dtype)
                           wq_ref,     # (Cq, C) query 1x1 conv
                           wk_ref,     # (Cq, C) key 1x1 conv
                           wv_ref,     # (C, C) value 1x1 conv (gamma_pa folded)
                           wf_ref,     # (C, C) fuse conv (BN scale folded)
                           bias_ref,   # (C, 1) f32 folded BN bias
                           o_ref,      # (1, C, TQ) f32 output tile
                           k_sc,       # (Cq, N) scratch (compute dtype)
                           vT_sc,      # (N, C)  scratch: value^T, gamma_pa folded
                           base_sc,    # (C, N)  scratch: gamma_ca*out_ca + 2*x
                           *, approx_recip):
    f32 = jnp.float32
    cdt = k_sc.dtype
    qi = pl.program_id(1)
    TQ = o_ref.shape[2]

    # ----- per-batch-element precompute (first query tile only) -----
    @pl.when(qi == 0)
    def _():
        xb = x_ref[0]                                            # (C, N)
        gamma_ca = gam_ref[0]

        # Key projection for the whole element (f32 accumulation on the MXU).
        k_sc[...] = jnp.dot(wk_ref[...], xb,
                            preferred_element_type=f32).astype(cdt)

        # v^T produced directly by the MXU: vT[n, o] = sum_c x[c, n] * wv[o, c]
        # (transposed contraction -> no (C, N) -> (N, C) XLU transpose).
        vT_sc[...] = lax.dot_general(
            xb, wv_ref[...], (((0,), (1,)), ((), ())),
            preferred_element_type=f32).astype(cdt)

        # Channel attention on the whole element (only (C, C) lives here).
        energy_c = lax.dot_general(
            xb, xb, (((1,), (1,)), ((), ())), preferred_element_type=f32)
        energy_new = jnp.max(energy_c, axis=-1, keepdims=True) - energy_c
        en = energy_new - jnp.max(energy_new, axis=-1, keepdims=True)  # stable
        pe = jnp.exp(en)
        inv_c = _recip(jnp.sum(pe, axis=-1, keepdims=True), approx_recip)
        # gamma_ca folded into the (C, 1) normalization — free vs a C*N multiply.
        attn_c = (pe * (inv_c * gamma_ca)).astype(cdt)               # (C, C)
        out_ca = jnp.dot(attn_c, xb, preferred_element_type=f32)     # (C, N)
        # base = (gamma_ca*out_ca + x) + x : both residual adds of pa & ca.
        # Stored in the compute dtype (it only feeds the fuse matmul anyway).
        base_sc[...] = (out_ca + 2.0 * xb.astype(f32)).astype(cdt)

    # ----- position attention for this query tile -----
    start = pl.multiple_of(qi * TQ, TQ)
    x_tile = x_ref[:, :, pl.ds(start, TQ)][0]                        # (C, TQ)
    q_tile = jnp.dot(wq_ref[...], x_tile,
                     preferred_element_type=f32).astype(cdt)         # (Cq, TQ)
    # energy[i, j] = sum_c q[c, i0+i] * k[c, j]
    energy = lax.dot_general(q_tile, k_sc[...], (((0,), (0,)), ((), ())),
                             preferred_element_type=f32)             # (TQ, N)
    m = jnp.max(energy, axis=-1, keepdims=True)
    p = jnp.exp(energy - m)                                          # f32 exp
    inv = _recip(jnp.sum(p, axis=-1, keepdims=True), approx_recip)   # (TQ, 1)

    # Late (flash-style) normalization: fold 1/l into the small (TQ, C) result.
    out_paT = jnp.dot(p.astype(cdt), vT_sc[...],
                      preferred_element_type=f32) * inv              # (TQ, C)
    # Residual adds in f32 registers, one cast feeding the fuse matmul.
    s = out_paT.T + base_sc[:, pl.ds(start, TQ)].astype(f32)         # (C, TQ)

    # ----- fuse: (BN-folded) 1x1 conv -> bias -> ReLU -----
    y = jnp.dot(wf_ref[...], s.astype(cdt), preferred_element_type=f32)
    y = jnp.maximum(y + bias_ref[...], 0.0)
    o_ref[0] = y.astype(o_ref.dtype)


def dual_attention(x, params, *, tq=None):
    """x: (B, C, H, W) float32.  Returns (B, C, H, W) float32."""
    B, C, H, W = x.shape
    assert C >= 8 and C % 8 == 0, "need C // 8 >= 1 and sublane-aligned C"
    N = H * W
    Cq = C // 8

    on_tpu = jax.default_backend() == "tpu"
    cdt = jnp.bfloat16 if on_tpu else jnp.float32   # MXU dtype only on TPU
    esize = 2 if cdt == jnp.bfloat16 else 4

    x2 = x.reshape(B, C, N).astype(cdt)

    # Query-tile size: largest 128-multiple dividing N, capped at 256 so the
    # per-tile (TQ, N) f32 temporaries also fit v7x's smaller VMEM.
    if tq is None:
        for cand in (256, 128):
            if N % cand == 0:
                tq = cand
                break
        else:
            tq = N
    assert N % tq == 0, f"N={N} must be divisible by tq={tq}"
    n_qt = N // tq

    # ------------- host-side weight folding (zero in-kernel cost) -------------
    gammas = params["gammas"].astype(jnp.float32)
    gamma_pa = gammas[0]
    gamma_ca = gammas[1:2]                            # (1,) scalar-prefetch operand
    wq = params["wq"].astype(cdt)
    wk = params["wk"].astype(cdt)
    wv = (gamma_pa * params["wv"]).astype(cdt)        # gamma_pa folded into value conv
    bn = params["bn"].astype(jnp.float32)
    bn_w, bn_b, rm, rv = bn[:, 0], bn[:, 1], bn[:, 2], bn[:, 3]
    scale = bn_w * lax.rsqrt(rv + 1e-5)
    wf = (scale[:, None] * params["wf"]).astype(cdt)  # BN scale folded into fuse conv
    bias = (bn_b - scale * rm)[:, None].astype(jnp.float32)           # (C, 1)

    # Per-generation VMEM limit: capacity minus headroom (v7x: 48 MiB,
    # v5e/v6e: 112 MiB); leave the compiler default if the query fails.
    vmem_limit = None
    if on_tpu:
        try:
            cap = int(pltpu.get_tpu_info().vmem_capacity_bytes)
            vmem_limit = min(cap - 16 * 1024 * 1024, 112 * 1024 * 1024)
        except Exception:
            vmem_limit = None

    flops = int(B * (2 * N * C * (2 * Cq + 4 * C) + 2 * N * N * (Cq + C)))
    transcendentals = int(B * (N * N + C * C))
    bytes_accessed = int(B * C * N * (esize + 4)
                         + (2 * Cq * C + 2 * C * C) * esize + 4 * C)

    grid_spec = pltpu.PrefetchScalarGridSpec(
        num_scalar_prefetch=1,
        grid=(B, n_qt),
        in_specs=[
            # full (C, N) slab, resident across query tiles of this batch elem
            pl.BlockSpec((1, C, N), lambda b, q, g: (b, 0, 0)),
            # weights: constant block index -> not re-DMA'd per grid step
            pl.BlockSpec((Cq, C), lambda b, q, g: (0, 0)),
            pl.BlockSpec((Cq, C), lambda b, q, g: (0, 0)),
            pl.BlockSpec((C, C), lambda b, q, g: (0, 0)),
            pl.BlockSpec((C, C), lambda b, q, g: (0, 0)),
            pl.BlockSpec((C, 1), lambda b, q, g: (0, 0)),
        ],
        out_specs=pl.BlockSpec((1, C, tq), lambda b, q, g: (b, 0, q)),
        scratch_shapes=[
            pltpu.VMEM((Cq, N), cdt),    # k
            pltpu.VMEM((N, C), cdt),     # v^T (gamma_pa folded)
            pltpu.VMEM((C, N), cdt),     # gamma_ca*out_ca + 2*x
        ],
    )

    kernel = functools.partial(_dual_attention_kernel, approx_recip=on_tpu)

    out = pl.pallas_call(
        kernel,
        out_shape=jax.ShapeDtypeStruct((B, C, N), jnp.float32),
        grid_spec=grid_spec,
        compiler_params=pltpu.CompilerParams(
            # batch axis split across TensorCores; query axis must stay
            # "arbitrary" because per-batch scratch is computed at qi == 0.
            dimension_semantics=("parallel", "arbitrary"),
            vmem_limit_bytes=vmem_limit,
        ),
        cost_estimate=pl.CostEstimate(
            flops=flops, transcendentals=transcendentals,
            bytes_accessed=bytes_accessed),
    )(gamma_ca, x2, wq, wk, wv, wf, bias)

    return out.reshape(B, C, H, W)


def dual_attention_ref(x, params):
    """Pure-JAX f32 reference of the same forward pass (for verification)."""
    B, C, H, W = x.shape
    N = H * W
    xf = x.reshape(B, C, N).astype(jnp.float32)
    wq, wk, wv, wf = params["wq"], params["wk"], params["wv"], params["wf"]
    gamma_pa, gamma_ca = params["gammas"][0], params["gammas"][1]
    bn = params["bn"]
    bn_w, bn_b, rm, rv = bn[:, 0], bn[:, 1], bn[:, 2], bn[:, 3]

    # position attention
    q = jnp.einsum("oc,bcn->bon", wq, xf)
    k = jnp.einsum("oc,bcn->bon", wk, xf)
    v = jnp.einsum("oc,bcn->bon", wv, xf)
    energy = jnp.einsum("bci,bcj->bij", q, k)
    attn = jax.nn.softmax(energy, axis=-1)
    out_pa = jnp.einsum("bcj,bij->bci", v, attn)
    pa = gamma_pa * out_pa + xf

    # channel attention
    energy_c = jnp.einsum("bin,bjn->bij", xf, xf)
    energy_new = jnp.max(energy_c, axis=-1, keepdims=True) - energy_c
    attn_c = jax.nn.softmax(energy_new, axis=-1)
    out_ca = jnp.einsum("bij,bjn->bin", attn_c, xf)
    ca = gamma_ca * out_ca + xf

    # fuse
    s = pa + ca
    y = jnp.einsum("oc,bcn->bon", wf, s)
    y = (y - rm[None, :, None]) * (bn_w * lax.rsqrt(rv + 1e-5))[None, :, None] \
        + bn_b[None, :, None]
    y = jnp.maximum(y, 0.0)
    return y.reshape(B, C, H, W)


def init_params(key, C):
    Cq = C // 8
    k1, k2, k3, k4, k5, k6 = jax.random.split(key, 6)
    params = {
        # NOTE: PyTorch initializes gamma to 0; nonzero deterministic values
        # are used here so the attention paths actually contribute.
        "gammas": jnp.array([0.5, 0.7], dtype=jnp.float32),
        "wq": 0.2 * jax.random.normal(k1, (Cq, C), jnp.float32),
        "wk": 0.2 * jax.random.normal(k2, (Cq, C), jnp.float32),
        "wv": 0.2 * jax.random.normal(k3, (C, C), jnp.float32),
        "wf": 0.2 * jax.random.normal(k4, (C, C), jnp.float32),
        "bn": jnp.stack(
            [
                jax.random.uniform(k5, (C,), jnp.float32, 0.8, 1.2),  # bn weight
                0.1 * jax.random.normal(k6, (C,), jnp.float32),       # bn bias
                jnp.zeros((C,), jnp.float32),                          # running mean
                jnp.ones((C,), jnp.float32),                           # running var
            ],
            axis=1,
        ),
    }
    return params


if __name__ == "__main__":
    B, C, H, W = 2, 16, 16, 16
    key = jax.random.PRNGKey(0)
    kx, kp = jax.random.split(key)
    x = jax.random.normal(kx, (B, C, H, W), jnp.float32)
    params = init_params(kp, C)

    # tq=128 -> 2 query tiles per batch element (exercises the tiled path).
    out = jax.block_until_ready(dual_attention(x, params, tq=128))
    ref = jax.block_until_ready(dual_attention_ref(x, params))

    assert out.shape == (B, C, H, W)
    max_err = float(jnp.max(jnp.abs(out - ref)))
    ref_scale = float(jnp.max(jnp.abs(ref))) + 1e-6
    # bf16 MXU operands (f32 accumulation) + approx reciprocal on TPU loosen
    # the tolerance vs the pure-f32 reference; relative check with margin.
    assert max_err / ref_scale < 4e-2, (
        f"mismatch vs reference: max_err={max_err}, ref_scale={ref_scale}")
    print("KERNEL_OK")
</pallas_src>

<mosaic_0001>
module attributes {stable_mosaic.version = 11 : i64} {
  func.func @_dual_attention_kernel(%arg0: i32, %arg1: i32, %arg2: memref<1xf32, #tpu.memory_space<smem>>, %arg3: memref<1x16x256xf32, #tpu.memory_space<vmem>>, %arg4: memref<2x16xf32, #tpu.memory_space<vmem>>, %arg5: memref<2x16xf32, #tpu.memory_space<vmem>>, %arg6: memref<16x16xf32, #tpu.memory_space<vmem>>, %arg7: memref<16x16xf32, #tpu.memory_space<vmem>>, %arg8: memref<16x1xf32, #tpu.memory_space<vmem>>, %arg9: memref<1x16x128xf32, #tpu.memory_space<vmem>>, %arg10: memref<2x256xf32, #tpu.memory_space<vmem>>, %arg11: memref<256x16xf32, #tpu.memory_space<vmem>>, %arg12: memref<16x256xf32, #tpu.memory_space<vmem>>) attributes {dimension_semantics = [#tpu.dimension_semantics<parallel>, #tpu.dimension_semantics<arbitrary>], iteration_bounds = array<i64: 2, 2>, scalar_prefetch = 1 : i64, scratch_operands = 3 : i64, tpu.core_type = #tpu.core_type<tc>, window_params = [{transform_indices = @transform_0, window_bounds = array<i64: 1, 16, 256>}, {pipeline_mode = #tpu.pipeline_mode<synchronous>, transform_indices = @transform_1, window_bounds = array<i64: 2, 16>}, {pipeline_mode = #tpu.pipeline_mode<synchronous>, transform_indices = @transform_2, window_bounds = array<i64: 2, 16>}, {pipeline_mode = #tpu.pipeline_mode<synchronous>, transform_indices = @transform_3, window_bounds = array<i64: 16, 16>}, {pipeline_mode = #tpu.pipeline_mode<synchronous>, transform_indices = @transform_4, window_bounds = array<i64: 16, 16>}, {pipeline_mode = #tpu.pipeline_mode<synchronous>, transform_indices = @transform_5, window_bounds = array<i64: 16, 1>}, {transform_indices = @transform_6, window_bounds = array<i64: 1, 16, 128>}]} {
    %c0_i32 = arith.constant 0 : i32
    %0 = arith.cmpi eq, %arg1, %c0_i32 : i32
    %1 = arith.extui %0 : i1 to i32
    %c0_i32_0 = arith.constant 0 : i32
    %2 = arith.cmpi ne, %1, %c0_i32_0 : i32
    scf.if %2 {
      %c0_23 = arith.constant 0 : index
      %c0_24 = arith.constant 0 : index
      %c0_25 = arith.constant 0 : index
      %39 = vector.load %arg3[%c0_23, %c0_24, %c0_25] : memref<1x16x256xf32, #tpu.memory_space<vmem>>, vector<1x16x256xf32>
      %40 = vector.shape_cast %39 : vector<1x16x256xf32> to vector<16x256xf32>
      %c0_26 = arith.constant 0 : index
      %41 = memref.load %arg2[%c0_26] : memref<1xf32, #tpu.memory_space<smem>>
      %c0_27 = arith.constant 0 : index
      %c0_28 = arith.constant 0 : index
      %42 = vector.load %arg5[%c0_27, %c0_28] : memref<2x16xf32, #tpu.memory_space<vmem>>, vector<2x16xf32>
      %cst_29 = arith.constant dense<0.000000e+00> : vector<2x256xf32>
      %43 = tpu.matmul %42, %40, %cst_29 {dimension_numbers = #tpu.dot_dimension_numbers<[1], [0], [0], [1], [0, 0, 1, 1], [], []>} : vector<2x16xf32>, vector<16x256xf32>, vector<2x256xf32> -> vector<2x256xf32>
      %c0_30 = arith.constant 0 : index
      %c0_31 = arith.constant 0 : index
      %44 = vector.load %arg10[%c0_30, %c0_31] : memref<2x256xf32, #tpu.memory_space<vmem>>, vector<2x256xf32>
      tpu.vector_store %arg10[%c0_30, %c0_31], %43 {strides = array<i32>} : memref<2x256xf32, #tpu.memory_space<vmem>>, vector<2x256xf32>,
      %c0_32 = arith.constant 0 : index
      %c0_33 = arith.constant 0 : index
      %45 = vector.load %arg6[%c0_32, %c0_33] : memref<16x16xf32, #tpu.memory_space<vmem>>, vector<16x16xf32>
      %cst_34 = arith.constant dense<0.000000e+00> : vector<256x16xf32>
      %46 = tpu.matmul %40, %45, %cst_34 {dimension_numbers = #tpu.dot_dimension_numbers<[0], [1], [1], [0], [0, 1, 1, 0], [], []>} : vector<16x256xf32>, vector<16x16xf32>, vector<256x16xf32> -> vector<256x16xf32>
      %c0_35 = arith.constant 0 : index
      %c0_36 = arith.constant 0 : index
      %47 = vector.load %arg11[%c0_35, %c0_36] : memref<256x16xf32, #tpu.memory_space<vmem>>, vector<256x16xf32>
      tpu.vector_store %arg11[%c0_35, %c0_36], %46 {strides = array<i32>} : memref<256x16xf32, #tpu.memory_space<vmem>>, vector<256x16xf32>,
      %cst_37 = arith.constant dense<0.000000e+00> : vector<16x16xf32>
      %48 = tpu.matmul %40, %40, %cst_37 {dimension_numbers = #tpu.dot_dimension_numbers<[1], [1], [0], [0], [0, 0, 1, 0], [], []>} : vector<16x256xf32>, vector<16x256xf32>, vector<16x16xf32> -> vector<16x16xf32>
      %cst_38 = arith.constant dense<0xFF800000> : vector<16xf32>
      %49 = vector.multi_reduction <maximumf>, %48, %cst_38 [1] : vector<16x16xf32> to vector<16xf32>
      %50 = vector.shape_cast %49 : vector<16xf32> to vector<16x1xf32>
      %51 = vector.broadcast %50 : vector<16x1xf32> to vector<16x16xf32>
      %52 = arith.subf %51, %48 : vector<16x16xf32>
      %cst_39 = arith.constant dense<0xFF800000> : vector<16xf32>
      %53 = vector.multi_reduction <maximumf>, %52, %cst_39 [1] : vector<16x16xf32> to vector<16xf32>
      %54 = vector.shape_cast %53 : vector<16xf32> to vector<16x1xf32>
      %55 = vector.broadcast %54 : vector<16x1xf32> to vector<16x16xf32>
      %56 = arith.subf %52, %55 : vector<16x16xf32>
      %57 = math.exp %56 : vector<16x16xf32>
      %cst_40 = arith.constant dense<0.000000e+00> : vector<16xf32>
      %58 = vector.multi_reduction <add>, %57, %cst_40 [1] : vector<16x16xf32> to vector<16xf32>
      %59 = vector.shape_cast %58 : vector<16xf32> to vector<16x1xf32>
      %cst_41 = arith.constant 1.000000e+00 : f32
      %60 = vector.broadcast %cst_41 : f32 to vector<16x1xf32>
      %61 = arith.divf %60, %59 : vector<16x1xf32>
      %62 = vector.broadcast %41 : f32 to vector<16x1xf32>
      %63 = arith.mulf %61, %62 : vector<16x1xf32>
      %64 = vector.broadcast %63 : vector<16x1xf32> to vector<16x16xf32>
      %65 = arith.mulf %57, %64 : vector<16x16xf32>
      %cst_42 = arith.constant dense<0.000000e+00> : vector<16x256xf32>
      %66 = tpu.matmul %65, %40, %cst_42 {dimension_numbers = #tpu.dot_dimension_numbers<[1], [0], [0], [1], [0, 0, 1, 1], [], []>} : vector<16x16xf32>, vector<16x256xf32>, vector<16x256xf32> -> vector<16x256xf32>
      %cst_43 = arith.constant 2.000000e+00 : f32
      %67 = vector.broadcast %cst_43 : f32 to vector<16x256xf32>
      %68 = arith.mulf %67, %40 : vector<16x256xf32>
      %69 = arith.addf %66, %68 : vector<16x256xf32>
      %c0_44 = arith.constant 0 : index
      %c0_45 = arith.constant 0 : index
      %70 = vector.load %arg12[%c0_44, %c0_45] : memref<16x256xf32, #tpu.memory_space<vmem>>, vector<16x256xf32>
      tpu.vector_store %arg12[%c0_44, %c0_45], %69 {strides = array<i32>} : memref<16x256xf32, #tpu.memory_space<vmem>>, vector<16x256xf32>,
    } else {
    }
    %c128_i32 = arith.constant 128 : i32
    %3 = arith.muli %arg1, %c128_i32 : i32
    %4 = tpu.assume_multiple %3, 128 : i32
    %c0 = arith.constant 0 : index
    %c0_1 = arith.constant 0 : index
    %5 = arith.index_cast %4 : i32 to index
    %6 = vector.load %arg3[%c0, %c0_1, %5] : memref<1x16x256xf32, #tpu.memory_space<vmem>>, vector<1x16x128xf32>
    %7 = vector.shape_cast %6 : vector<1x16x128xf32> to vector<16x128xf32>
    %c0_2 = arith.constant 0 : index
    %c0_3 = arith.constant 0 : index
    %8 = vector.load %arg4[%c0_2, %c0_3] : memref<2x16xf32, #tpu.memory_space<vmem>>, vector<2x16xf32>
    %cst = arith.constant dense<0.000000e+00> : vector<2x128xf32>
    %9 = tpu.matmul %8, %7, %cst {dimension_numbers = #tpu.dot_dimension_numbers<[1], [0], [0], [1], [0, 0, 1, 1], [], []>} : vector<2x16xf32>, vector<16x128xf32>, vector<2x128xf32> -> vector<2x128xf32>
    %c0_4 = arith.constant 0 : index
    %c0_5 = arith.constant 0 : index
    %10 = vector.load %arg10[%c0_4, %c0_5] : memref<2x256xf32, #tpu.memory_space<vmem>>, vector<2x256xf32>
    %cst_6 = arith.constant dense<0.000000e+00> : vector<128x256xf32>
    %11 = tpu.matmul %9, %10, %cst_6 {dimension_numbers = #tpu.dot_dimension_numbers<[0], [0], [1], [1], [0, 1, 1, 1], [], []>} : vector<2x128xf32>, vector<2x256xf32>, vector<128x256xf32> -> vector<128x256xf32>
    %cst_7 = arith.constant dense<0xFF800000> : vector<128xf32>
    %12 = vector.multi_reduction <maximumf>, %11, %cst_7 [1] : vector<128x256xf32> to vector<128xf32>
    %13 = vector.shape_cast %12 : vector<128xf32> to vector<128x1xf32>
    %14 = vector.broadcast %13 : vector<128x1xf32> to vector<128x256xf32>
    %15 = arith.subf %11, %14 : vector<128x256xf32>
    %16 = math.exp %15 : vector<128x256xf32>
    %cst_8 = arith.constant dense<0.000000e+00> : vector<128xf32>
    %17 = vector.multi_reduction <add>, %16, %cst_8 [1] : vector<128x256xf32> to vector<128xf32>
    %18 = vector.shape_cast %17 : vector<128xf32> to vector<128x1xf32>
    %cst_9 = arith.constant 1.000000e+00 : f32
    %19 = vector.broadcast %cst_9 : f32 to vector<128x1xf32>
    %20 = arith.divf %19, %18 : vector<128x1xf32>
    %c0_10 = arith.constant 0 : index
    %c0_11 = arith.constant 0 : index
    %21 = vector.load %arg11[%c0_10, %c0_11] : memref<256x16xf32, #tpu.memory_space<vmem>>, vector<256x16xf32>
    %cst_12 = arith.constant dense<0.000000e+00> : vector<128x16xf32>
    %22 = tpu.matmul %16, %21, %cst_12 {dimension_numbers = #tpu.dot_dimension_numbers<[1], [0], [0], [1], [0, 0, 1, 1], [], []>} : vector<128x256xf32>, vector<256x16xf32>, vector<128x16xf32> -> vector<128x16xf32>
    %23 = vector.broadcast %20 : vector<128x1xf32> to vector<128x16xf32>
    %24 = arith.mulf %22, %23 : vector<128x16xf32>
    %25 = tpu.transpose %24, [1, 0] : vector<128x16xf32> -> vector<16x128xf32>
    %c0_13 = arith.constant 0 : index
    %26 = arith.index_cast %4 : i32 to index
    %27 = vector.load %arg12[%c0_13, %26] : memref<16x256xf32, #tpu.memory_space<vmem>>, vector<16x128xf32>
    %28 = arith.addf %25, %27 : vector<16x128xf32>
    %c0_14 = arith.constant 0 : index
    %c0_15 = arith.constant 0 : index
    %29 = vector.load %arg7[%c0_14, %c0_15] : memref<16x16xf32, #tpu.memory_space<vmem>>, vector<16x16xf32>
    %cst_16 = arith.constant dense<0.000000e+00> : vector<16x128xf32>
    %30 = tpu.matmul %29, %28, %cst_16 {dimension_numbers = #tpu.dot_dimension_numbers<[1], [0], [0], [1], [0, 0, 1, 1], [], []>} : vector<16x16xf32>, vector<16x128xf32>, vector<16x128xf32> -> vector<16x128xf32>
    %c0_17 = arith.constant 0 : index
    %c0_18 = arith.constant 0 : index
    %31 = vector.load %arg8[%c0_17, %c0_18] : memref<16x1xf32, #tpu.memory_space<vmem>>, vector<16x1xf32>
    %32 = vector.broadcast %31 : vector<16x1xf32> to vector<16x128xf32>
    %33 = arith.addf %30, %32 : vector<16x128xf32>
    %cst_19 = arith.constant 0.000000e+00 : f32
    %34 = vector.broadcast %cst_19 : f32 to vector<16x128xf32>
    %35 = arith.maximumf %33, %34 : vector<16x128xf32>
    %c0_20 = arith.constant 0 : index
    %c0_21 = arith.constant 0 : index
    %c0_22 = arith.constant 0 : index
    %36 = vector.load %arg9[%c0_20, %c0_21, %c0_22] : memref<1x16x128xf32, #tpu.memory_space<vmem>>, vector<1x16x128xf32>
    %37 = vector.shape_cast %36 : vector<1x16x128xf32> to vector<16x128xf32>
    %38 = vector.shape_cast %35 : vector<16x128xf32> to vector<1x16x128xf32>
    tpu.vector_store %arg9[%c0_20, %c0_21, %c0_22], %38 {strides = array<i32>} : memref<1x16x128xf32, #tpu.memory_space<vmem>>, vector<1x16x128xf32>,
    return
  }
  func.func @transform_0(%arg0: i32, %arg1: i32, %arg2: memref<1xf32, #tpu.memory_space<smem>>) -> (i32, i32, i32) {
    %c0_i32 = arith.constant 0 : i32
    %c0_i32_0 = arith.constant 0 : i32
    %c0_i32_1 = arith.constant 0 : i32
    return %arg0, %c0_i32, %c0_i32_0 : i32, i32, i32
  }
  func.func @transform_1(%arg0: i32, %arg1: i32, %arg2: memref<1xf32, #tpu.memory_space<smem>>) -> (i32, i32) {
    %c0_i32 = arith.constant 0 : i32
    %c0_i32_0 = arith.constant 0 : i32
    %c0_i32_1 = arith.constant 0 : i32
    return %c0_i32, %c0_i32_0 : i32, i32
  }
  func.func @transform_2(%arg0: i32, %arg1: i32, %arg2: memref<1xf32, #tpu.memory_space<smem>>) -> (i32, i32) {
    %c0_i32 = arith.constant 0 : i32
    %c0_i32_0 = arith.constant 0 : i32
    %c0_i32_1 = arith.constant 0 : i32
    return %c0_i32, %c0_i32_0 : i32, i32
  }
  func.func @transform_3(%arg0: i32, %arg1: i32, %arg2: memref<1xf32, #tpu.memory_space<smem>>) -> (i32, i32) {
    %c0_i32 = arith.constant 0 : i32
    %c0_i32_0 = arith.constant 0 : i32
    %c0_i32_1 = arith.constant 0 : i32
    return %c0_i32, %c0_i32_0 : i32, i32
  }
  func.func @transform_4(%arg0: i32, %arg1: i32, %arg2: memref<1xf32, #tpu.memory_space<smem>>) -> (i32, i32) {
    %c0_i32 = arith.constant 0 : i32
    %c0_i32_0 = arith.constant 0 : i32
    %c0_i32_1 = arith.constant 0 : i32
    return %c0_i32, %c0_i32_0 : i32, i32
  }
  func.func @transform_5(%arg0: i32, %arg1: i32, %arg2: memref<1xf32, #tpu.memory_space<smem>>) -> (i32, i32) {
    %c0_i32 = arith.constant 0 : i32
    %c0_i32_0 = arith.constant 0 : i32
    %c0_i32_1 = arith.constant 0 : i32
    return %c0_i32, %c0_i32_0 : i32, i32
  }
  func.func @transform_6(%arg0: i32, %arg1: i32, %arg2: memref<1xf32, #tpu.memory_space<smem>>) -> (i32, i32, i32) {
    %c0_i32 = arith.constant 0 : i32
    %c0_i32_0 = arith.constant 0 : i32
    return %arg0, %c0_i32, %arg1 : i32, i32, i32
  }
}

</mosaic_0001>

<bundles_post_ra>
// kernel: tpu_custom_call.1
= control target key start
LH: loop header
LB: loop body
LE: loop exit
PB: predicated region body
PF: predicated region fallthrough
CT: control target
= control target key end

     0   :  { %s3418_s0 = inlined_call_operand.<no memory space> [shape: f32[1], index: 0, kind: input, shape index: {}]   ;;  %s3419_s1 = inlined_call_operand.hbm [shape: f32[2,16,256], index: 1, kind: input, shape index: {}]   ;;  %s3420_s2 = inlined_call_operand.vmem [shape: f32[2,16], index: 2, kind: input, shape index: {}]   ;;  %s3421_s3 = inlined_call_operand.hbm [shape: f32[2,16], index: 3, kind: input, shape index: {}]   ;;  %s3422_s4 = inlined_call_operand.vmem [shape: f32[16,16], index: 4, kind: input, shape index: {}]   ;;  %s3423_s5 = inlined_call_operand.vmem [shape: f32[16,16], index: 5, kind: input, shape index: {}]   ;;  %s3424_s6 = inlined_call_operand.vmem [shape: f32[16,1], index: 6, kind: input, shape index: {}]   ;;  %s3425_s7 = inlined_call_operand.hbm [shape: f32[2,16,256], index: 7, kind: output, shape index: {}]  }
   0x1   :  { %3441 = sst [smem:[#allocation22_spill]] %s3421_s3 }
   0x2   :  { %3442 = sst [smem:[#allocation23_spill]] %s3425_s7 }
   0x3   :  { %12 = sst [smem:[#allocation6]] %s3418_s0 }
   0x4   :  { %13 = vsyncpa [#allocation8], 0 }
   0x5   :  { %15 = vsyncpa [#allocation8 + $0x1], 0 }
   0x6   :  { %16 = vsyncpa [#allocation11], 0 }
   0x7   :  { %17 = vsyncpa [#allocation9], 0 }
   0x8   :  { %19 = vsyncpa [#allocation9 + $0x1], 0  ;;  %s2844_s26 = smov 0   ;;  %s2846_s27 = smov 0  }
   0x9   :  { %s2848_s28 = smov 0   ;;  %s2850_s29 = smov 0  }
   0xa   :  { %s2852_s30 = smov 0   ;;  %s2854_s8 = smov 0  }
   0xb   :  { %s2856_s9 = smov 0   ;;  %s2858_s0 = smov 0  }
   0xc   :  { %s2860_s10 = smov 0   ;;  %s2862_s11 = smov 0  }
   0xd   :  { %s2864_s12 = smov 0  }
   0xe LB: > { %3443 = sst [smem:[#allocation16_spill]] %s2746_s26  ;;  %s2030_s13 = sadd.s32 4294967295, %s2786_s12   ;;  %s2786_s12 = sphi %s2864_s12, %s25_s12   ;;  %s2782_s11 = sphi %s2862_s11, %s3480_s11   ;;  %s2778_s10 = sphi %s2860_s10, %s3479_s10   ;;  %s2774_s0 = sphi %s2858_s0, %s3478_s0   ;;  %s2770_s9 = sphi %s2856_s9, %s3470_s9   ;;  %s2766_s8 = sphi %s2854_s8, %s3477_s8   ;;  %s2762_s30 = sphi %s2852_s30, %s3476_s30   ;;  %s2758_s29 = sphi %s2850_s29, %s3475_s29   ;;  %s2754_s28 = sphi %s2848_s28, %s3474_s28   ;;  %s2750_s27 = sphi %s2846_s27, %s3473_s27   ;;  %s2746_s26 = sphi %s2844_s26, %s3472_s26  }
   0xf   : > { %3444 = sst [smem:[#allocation17_spill]] %s2778_s10  ;;  %s2031_s14 = sadd.s32 4294967294, %s2786_s12  }
  0x10   : > { %3445 = sst [smem:[#allocation18_spill]] %s2786_s12  ;;  %p51_p0 = scmp.ne.s32.totalorder %s2766_s8, %s2762_s30 }
  0x11   : > { %p52_p1 = scmp.eq.s32.totalorder %s2786_s12, 0  ;;  %p57_p2 = scmp.ne.s32.totalorder %s2762_s30, %s2758_s29 }
  0x12   : > { %p2904_p3 = scmp.eq.s32.totalorder %s2030_s13, 0  ;;  %p187_p5 = scmp.ne.s32.totalorder %s2754_s28, %s2750_s27 }
  0x13   : > { %p2908_p4 = por %p52_p1, %p51_p0  ;;  %p188_p7 = scmp.eq.s32.totalorder %s2030_s13, 3 }
  0x14   : > { %s3446_s16 = scalar_select %p2904_p3, 1, 0 }
  0x15   : > { %p2916_p6 = por %p2904_p3, %p57_p2  ;;  %p193_p8 = scmp.ne.s32.totalorder %s2750_s27, %s2746_s26 }
  0x16   : > { %p194_p9 = scmp.eq.s32.totalorder %s2031_s14, 3  ;;  %p2922_p10 = por %p188_p7, %p187_p5 }
  0x17   : > { %s3448_s18 = scalar_select %p2916_p6, 1, 0 }
  0x18   : > { %s3449_s19 = scalar_select %p2922_p10, 1, 0 }
  0x19   : > { %p2032_p11 = scmp.ge.s32.totalorder %s2786_s12, 1  ;;  %p2927_p12 = por %p194_p9, %p193_p8 }
  0x1a   : > { %3450 = sst [smem:[#allocation19_spill]] %s3449_s19  ;;  %p201_p13 = scmp.lt.s32.totalorder %s2786_s12, 5 }
  0x1b   : > { %s3451_s20 = scalar_select %p2927_p12, 1, 0 }
  0x1c   : > { %p2932_p0 = pnand %p2032_p11, %p201_p13  ;;  %s2788_s22 = smov [#allocation10]  }
  0x1d   : > { %3452 = sst [smem:[#allocation20_spill]] %s3451_s20  ;;  %s217_s23 = sshll.u32 %s2788_s22, 4  ;;  %s218_s23 = int_to_ptr.vmem [resolvable:$true] %s217_s23 }
  0x1e   : > { %s3453_s21 = scalar_select %p2932_p0, 1, 0 }
  0x1f   : > { %p2382_p1 = pneg %p2932_p0  ;;  %p2395_p2 = scmp.lt.s32.totalorder %s2786_s12, 4 }
  0x20   : > { %s3456_s3 = sld [smem:[#allocation22_spill]] }
  0x21   : > { %p2941_p5 = pnand %p2382_p1, %p2904_p3  ;;  %p2947_p7 = pnand %p2395_p2, %p2908_p4 }
  0x23   : > { %s3455_s25 = scalar_select %p2947_p7, 1, 0 }
  0x24   : > { %p2604_p9 = pneg %p2941_p5 }
  0x26   : > { %s2602_s14 = scalar_lea.hbm %s3456_s3, 32 }
  0x27   : > { %p2603_p8 = scmp.ne.s32.totalorder %s3456_s3, %s2602_s14  ;;  %p2609_p1 = scmp.lt.u32.totalorder %s2602_s14, %s3456_s3 }
  0x29   : > { %p2605_p11 = pnand %p2604_p9, %p2603_p8 }
  0x2b   : > { %p2606_p13 = pneg %p2605_p11 }
  0x2d   : > { %p2611_p4 = pnand %p2609_p1, %p2606_p13 }
  0x2f   : > { %2614 = shalt.err (!%p2611_p4)
}
  0x30   : > { %s2615_s17 = scalar_lea.vmem %s218_s23, 32  ;;  %p2623_p3 = scmp.lt.s32.totalorder %s218_s23, %s218_s23 }
  0x31   : > { %p2616_p2 = scmp.ne.s32.totalorder %s218_s23, %s2615_s17  ;;  %p2624_p6 = scmp.lt.s32.totalorder %s2615_s17, %s2615_s17 }
  0x33   : > { %p2618_p12 = pnand %p2616_p2, %p2604_p9  ;;  %p2625_p0 = por %p2624_p6, %p2623_p3 }
  0x35   : > { %p2619_p10 = pneg %p2618_p12 }
  0x37   : > { %p2626_p7 = pnand %p2625_p0, %p2619_p10 }
  0x39   : > { %2629 = shalt.err (!%p2626_p7)
}
  0x3a   : > { %2385 = dma.hbm_to_vmem [thread:$0]  (!%p2941_p5), %s3456_s3, 32, %s218_s23, [#allocation11]  }
  0x3b   : > { %s34_s26 = sadd.s32 1, %s2778_s10  ;;  %s37_s20 = sadd.s32 1, %s2782_s11 }
  0x3c   : > { %p35_p12 = scmp.ge.s32.totalorder %s34_s26, 2  ;;  %s237_s13 = sand.u32 1, %s2766_s8  }
  0x3d   : > { %s177_s14 = sadd.s32 1, %s2754_s28  ;;  %s2035_s24 = sshll.u32 %s237_s13, 5 }
  0x3e   : > { %s3482_s26 = smov (%p35_p12, %s34_s26), 0  ;;  %s3484_s20 = smov (!%p35_p12, %s37_s20), %s2782_s11 }
  0x3f   : > { %3457 = sst [smem:[#allocation21_spill]] %s3482_s26  ;;  %p39_p3 = scmp.ge.s32.totalorder %s3484_s20, 2 }
  0x40   : > { %s2111_s22 = sshll.u32 %s2782_s11, 9  ;;  %s173_s17 = ssub.s32 %s2778_s10, %s3482_s26 }
  0x41   : > { %s241_s23 = scalar_lea.vmem [#allocation7], %s2035_s24  ;;  %s3486_s20 = smov (%p39_p3, %s3484_s20), 0 }
  0x42   : > { %s248_s15 = sshll.u32 %s241_s23, 4  ;;  %s2982_s12 = scalar_lea.hbm %s3419_s1, %s2111_s22  ;;  %s2984_s15 = int_to_ptr.vmem [resolvable:$true] %s248_s15 }
  0x43   : > { %s41_s7 = ssub.s32 %s2782_s11, %s3486_s20  ;;  %s3458_s24 = sadd.s32 1, %s2766_s8 }
  0x44   : > { %p42_p6 = scmp.eq.s32.totalorder %s41_s7, 0  ;;  %s174_s26 = sor.u32 %s173_s17, %s41_s7 }
  0x45   : > { %p175_p10 = scmp.eq.s32.totalorder %s174_s26, 0  ;;  %s2996_s19 = scalar_lea.sflag [#allocation8], %s237_s13 }
  0x46   : > { %s2991_s23 = scalar_select %p42_p6, %s2766_s8, %s3458_s24  }
  0x47   : > { %s2994_s10 = scalar_select %p175_p10, %s2754_s28, %s177_s14  }
  0x48   : > { %s2630_s3 = scalar_lea.hbm %s2982_s12, 512  ;;  %p3459_p5 = scmp.ne.s32.totalorder %s3455_s25, 0 }
  0x49   : > { %p2631_p0 = scmp.ne.s32.totalorder %s2982_s12, %s2630_s3  ;;  %s2635_s7 = scalar_lea.hbm %s3419_s1, 1024 }
  0x4a   : > { %p2632_p7 = pneg %p3459_p5  ;;  %p2636_p11 = scmp.lt.u32.totalorder %s2982_s12, %s3419_s1 }
  0x4b   : > { %p2637_p13 = scmp.lt.u32.totalorder %s2635_s7, %s2630_s3  ;;  %p2639_p4 = scmp.lt.u32.totalorder %s2630_s3, %s2982_s12 }
  0x4c   : > { %p2633_p8 = pnand %p2632_p7, %p2631_p0 }
  0x4d   : > { %p2638_p1 = por %p2637_p13, %p2636_p11 }
  0x4e   : > { %p2634_p9 = pneg %p2633_p8 }
  0x4f   : > { %p2640_p2 = por %p2639_p4, %p2638_p1 }
  0x51   : > { %p2641_p12 = pnand %p2640_p2, %p2634_p9 }
  0x53   : > { %2644 = shalt.err (!%p2641_p12)
}
  0x54   : > { %s2645_s13 = scalar_lea.vmem %s2984_s15, 512  ;;  %s2789_s14 = smov [#allocation7]  }
  0x55   : > { %p2646_p3 = scmp.ne.s32.totalorder %s2984_s15, %s2645_s13  ;;  %s2650_s24 = sshll.u32 %s2789_s14, 4  ;;  %s2651_s24 = int_to_ptr.vmem [resolvable:$false] %s2650_s24 }
  0x56   : > { %s2652_s22 = scalar_lea.vmem %s2651_s24, 1024  ;;  %p2653_p0 = scmp.lt.s32.totalorder %s2984_s15, %s2651_s24 }
  0x57   : > { %p2648_p6 = pnand %p2646_p3, %p2632_p7  ;;  %p2654_p8 = scmp.lt.s32.totalorder %s2652_s22, %s2645_s13 }
  0x59   : > { %p2649_p10 = pneg %p2648_p6  ;;  %p2655_p11 = por %p2654_p8, %p2653_p0 }
  0x5b   : > { %p2656_p13 = pnand %p2655_p11, %p2649_p10 }
  0x5d   : > { %2659 = shalt.err (!%p2656_p13)
}
  0x5e   : > { %s2790_s3 = smov 256   ;;  %s2791_s29 = smov 16  }
  0x5f   : > { %2389 = dma.hbm_to_vmem [thread:$0]  (!%p3459_p5), %s2982_s12, 512, %s2984_s15, %s2996_s19, %s2790_s3, %s2790_s3, %s2791_s29  }
  0x60   : > { %p3460_p7 = scmp.ne.s32.totalorder %s3453_s21, 0 }
  0x61   : > { %s262_s7 = sand.u32 (!%p3460_p7), 1, %s2762_s30   ;;  %p3461_p9 = scmp.ne.s32.totalorder (!%p3460_p7), %s3448_s18, 0 }
  0x62   : > { %260 = sbr.rel (%p3460_p7) target bundleno = 2570 (0xa0a), region = 44  ;;  %s2039_s26 = sshll.u32 (!%p3460_p7), %s262_s7, 5 }
  0x63   : > { %s263_s17 = scalar_lea.sflag (!%p3460_p7), [#allocation8], %s262_s7  ;;  %s3027_s13 = scalar_lea.vmem (!%p3460_p7), [#allocation7], %s2039_s26 }
  0x69   : > { %2733 = dma.done.wait (%p3461_p9), %s263_s17, 512  }
  0x6a   : > { %2735 = vsyncadd (%p3461_p9), %s263_s17, 4294966784  ;;  %p3462_p1 = scmp.ne.s32.totalorder %s3446_s16, 0 }
  0x6c   : > { %2737 = dma.done.wait (%p3462_p1), [#allocation11], 32  }
  0x6d   : > { %2739 = vsyncadd (%p3462_p1), [#allocation11], 4294967264  ;;  %s296_s12 = sand.u32 1, %s2750_s27   ;;  %p2042_p5 = scmp.ne.s32.totalorder %s2770_s9, 0 }
  0x6e   : > { %s2041_s19 = sshll.u32 %s296_s12, 4  ;;  %v3044_v0 = vld [vmem:[%s3027_s13] sm:$0xff] (!%p2042_p5)  ;;  %v3047_v1 = vld [vmem:[%s3027_s13 + $0x10] sm:$0xff] (!%p2042_p5)  ;;  %v3050_v2 = vld [vmem:[%s3027_s13 + $0x8] sm:$0xff] (!%p2042_p5)  ;;  %vm309_vm0 = vcmask (!%p2042_p5), 130048   ;;  %v2792_v5 = vmov (!%p2042_p5), 0.0  }
  0x6f   : > { %s3040_s21 = scalar_lea.vmem [#allocation12], %s2041_s19  ;;  %302 = sbr.rel (%p2042_p5) target bundleno = 1254 (0x4e6), region = 56  ;;  %398 = vxpose.xlu0.b32.start [1/2] (short) (!%p2042_p5), %v3044_v0, 128  ;;  %v3054_v3 = vld [vmem:[%s3027_s13 + $0x18] sm:$0xff] (!%p2042_p5)  ;;  %v2301_v4 = vpack.c.bf16 (!%p2042_p5), %v3047_v1, %v3044_v0  ;;  %377 = vmatprep.mubr.f32.mxu0 (!%p2042_p5), %v2792_v5  ;;  %v397_v7 = vld [vmem:[%s3422_s4 + $0x8] sm:$0xff] (!%p2042_p5)  ;;  %vm2304_vm1 = vmpackc.low (!%p2042_p5), %vm309_vm0, %vm309_vm0 }
  0x70   : > { %v396_v6 = vld [vmem:[%s3422_s4] sm:$0xff] (!%p2042_p5)  ;;  %v2299_v8 = vpack.c.bf16 (!%p2042_p5), %v3054_v3, %v3050_v2  ;;  %s307_s14 = sld [smem:[#allocation6]] (!%p2042_p5) }
  0x71   : > { %v2303_v9 = vpack.c.bf16 (!%p2042_p5), %v397_v7, %v396_v6  ;;  %v308_v10 = vld [vmem:[#allocation10] sm:$0x3] (!%p2042_p5) }
  0x72   : > { %2300 = vmatprep.subr.bf16.mxu0 (!%p2042_p5), %v2299_v8 }
  0x73   : > { %2356 = vmatprep.subr.msk.bf16.mxu1 (!%p2042_p5), %vm2304_vm1, %v2303_v9  ;;  %399 = vxpose.xlu0.b32.end [2/2] (short) (!%p2042_p5), %v3047_v1, 128 }
  0x74   : > { %2302 = vmatpush1.bf16.msra.mxu0 (!%p2042_p5), %v2301_v4  ;;  %2357 = vmatpush3.bf16.xpose.msk.msra.mxu1 (!%p2042_p5), %vm2304_vm1, %v2303_v9 }
  0x75   : > { %2305 = vmatprep.subr.msk.bf16.mxu0 (!%p2042_p5), %vm2304_vm1, %v2303_v9 }
  0x77   : > { %2043 = vmatmul.mubr.msk.f32.vlgmr.msra.gmra.mrb[0].mxu0 %vm309_vm0, %v308_v10 }
  0x7d   : > { %2308 = vmatpush3.bf16.xpose.msk.msra.mxu0 %vm2304_vm1, %v2303_v9 }
  0x7e   : > { %2310 = vmatprep.subr.bf16.mxu0 %v2299_v8 }
  0xef   : > { %v414_v11 = vpop.trf.xlu0 }
  0xf0   : > { %2237 = vmatprep.mubr.msk.f32.mxu0 %vm309_vm0, %v414_v11  ;;  %v926_v11 = vstv %s307_s14 }
  0xf3   : > { %v415_v12 = vpop.trf.xlu0 }
  0xf4   : > { %2238 = vmatmul.mubr.msk.f32.vlgmr.msra.gmra.mrb[2].mxu0 %vm309_vm0, %v415_v12 }
  0xf5   : > { %2312 = vmatpush1.bf16.xpose.msra.mxu0 %v2301_v4 }
  0xf6   : > { %2314 = vmatprep.subr.bf16.mxu0 %v2299_v8 }
  0xf7   : > { %v416_v13 = vpop.trf.xlu0 }
  0xf8   : > { %2240 = vmatprep.mubr.msk.f32.mxu0 %vm309_vm0, %v416_v13 }
  0xfb   : > { %v417_v14 = vpop.trf.xlu0 }
  0xfc   : > { %2241 = vmatmul.mubr.msk.f32.gmra.mrb[4].mxu0 %vm309_vm0, %v417_v14 }
  0xff   : > { %v418_v15 = vpop.trf.xlu0 }
 0x100   : > { %2243 = vmatprep.mubr.msk.f32.mxu0 %vm309_vm0, %v418_v15 }
 0x103   : > { %v419_v16 = vpop.trf.xlu0 }
 0x104   : > { %2244 = vmatmul.mubr.msk.f32.gmra.mrb[6].mxu0 %vm309_vm0, %v419_v16 }
 0x107   : > { %v420_v17 = vpop.trf.xlu0 }
 0x108   : > { %2246 = vmatprep.mubr.msk.f32.mxu0 %vm309_vm0, %v420_v17 }
 0x10b   : > { %v421_v18 = vpop.trf.xlu0 }
 0x10c   : > { %2247 = vmatmul.mubr.msk.f32.gmra.mrb[8].mxu0 %vm309_vm0, %v421_v18 }
 0x10f   : > { %v422_v19 = vpop.trf.xlu0 }
 0x110   : > { %2249 = vmatprep.mubr.msk.f32.mxu0 %vm309_vm0, %v422_v19 }
 0x113   : > { %v423_v20 = vpop.trf.xlu0 }
 0x114   : > { %2250 = vmatmul.mubr.msk.f32.gmra.mrb[10].mxu0 %vm309_vm0, %v423_v20 }
 0x115   : > { %885 = vmatprep.mubr.f32.mxu0 %v3050_v2 }
 0x117   : > { %v424_v40 = vpop.trf.xlu0 }
 0x118   : > { %886 = vmatmul.mubr.f32.vlgmr.msra.gmra.mrb[12].mxu0 %v3044_v0  ;;  %2252 = vmatprep.mubr.msk.f32.mxu1 %vm309_vm0, %v424_v40  ;;  %v934_v40 = vmul.f32 2.0, %v3054_v3 }
 0x119   : > { %890 = vmatprep.mubr.f32.mxu0 %v3054_v3  ;;  %2316 = vmatpush1.bf16.msra.mxu0 %v2301_v4 }
 0x11b   : > { %v425_v41 = vpop.trf.xlu0 }
 0x11c   : > { %891 = vmatmul.mubr.f32.gmra.mrb[14].mxu0 %v3047_v1  ;;  %2253 = vmatmul.mubr.msk.f32.vlgmr.msra.gmra.mrb[0].mxu1 %vm309_vm0, %v425_v41 }
 0x11d   : > { %1005 = vmatprep.mubr.f32.mxu0 %v2792_v5 }
 0x11f   : > { %v426_v42 = vpop.trf.xlu0 }
 0x120   : > { %2255 = vmatprep.mubr.msk.f32.mxu1 %vm309_vm0, %v426_v42 }
 0x123   : > { %v427_v43 = vpop.trf.xlu0 }
 0x124   : > { %2256 = vmatmul.mubr.msk.f32.gmra.mrb[2].mxu1 %vm309_vm0, %v427_v43 }
 0x127   : > { %v428_v44 = vpop.trf.xlu0 }
 0x128   : > { %2258 = vmatprep.mubr.msk.f32.mxu1 %vm309_vm0, %v428_v44 }
 0x12b   : > { %v429_v45 = vpop.trf.xlu0 }
 0x12c   : > { %2259 = vmatmul.mubr.msk.f32.gmra.mrb[4].mxu1 %vm309_vm0, %v429_v45 }
 0x14a   : > { %v379_v21 = vpop.f32.mrb[0].mxu0 }
 0x14b   : > { %v381_v22 = vpop.f32.mrb[1].mxu0 }
 0x14c   : > { %v386_v23 = vcombine.low %v379_v21, %v381_v22 }
 0x14e   : > { %2044 = vst.sshfl [vmem:[#allocation2] sm:$0x33 pattern:$0x76325410] %v386_v23 }
 0x1c7   : > { %v2239_v24 = vpop.f32.mrb[2].mxu0 }
 0x1c8   : > { %790 = vst.msk [vmem:[#allocation3 + $0x8] sm:$0xff] %vm309_vm0, %v2239_v24  ;;  %v630_v25 = vpop.f32.mrb[3].mxu0 }
 0x1c9   : > { %789 = vst.msk [vmem:[#allocation3] sm:$0xff] %vm309_vm0, %v630_v25 }
 0x1cf   : > { %v2242_v26 = vpop.f32.mrb[4].mxu0 }
 0x1d0   : > { %792 = vst.msk [vmem:[#allocation3 + $0x18] sm:$0xff] %vm309_vm0, %v2242_v26  ;;  %v640_v27 = vpop.f32.mrb[5].mxu0 }
 0x1d1   : > { %791 = vst.msk [vmem:[#allocation3 + $0x10] sm:$0xff] %vm309_vm0, %v640_v27 }
 0x1d7   : > { %v2245_v28 = vpop.f32.mrb[6].mxu0 }
 0x1d8   : > { %794 = vst.msk [vmem:[#allocation3 + $0x28] sm:$0xff] %vm309_vm0, %v2245_v28  ;;  %v650_v29 = vpop.f32.mrb[7].mxu0 }
 0x1d9   : > { %793 = vst.msk [vmem:[#allocation3 + $0x20] sm:$0xff] %vm309_vm0, %v650_v29 }
 0x1df   : > { %v2248_v30 = vpop.f32.mrb[8].mxu0 }
 0x1e0   : > { %796 = vst.msk [vmem:[#allocation3 + $0x38] sm:$0xff] %vm309_vm0, %v2248_v30  ;;  %v660_v31 = vpop.f32.mrb[9].mxu0 }
 0x1e1   : > { %795 = vst.msk [vmem:[#allocation3 + $0x30] sm:$0xff] %vm309_vm0, %v660_v31 }
 0x1e7   : > { %v2251_v32 = vpop.f32.mrb[10].mxu0 }
 0x1e8   : > { %798 = vst.msk [vmem:[#allocation3 + $0x48] sm:$0xff] %vm309_vm0, %v2251_v32  ;;  %v670_v33 = vpop.f32.mrb[11].mxu0 }
 0x1e9   : > { %797 = vst.msk [vmem:[#allocation3 + $0x40] sm:$0xff] %vm309_vm0, %v670_v33  ;;  %v931_v33 = vmul.f32 2.0, %v3044_v0 }
 0x1eb   : > { %v887_v34 = vpop.f32.mrb[12].mxu0 }
 0x1ec   : > { %v889_v35 = vpop.f32.mrb[13].mxu0  ;;  %v896_v36 = vsel %vm309_vm0, %v887_v34, -inf }
 0x1ed   : > { %897 = vmax.xlane.f32.xlu1 %v896_v36 }
 0x1ef   : > { %v892_v37 = vpop.f32.mrb[14].mxu0  ;;  %v2254_v62 = vpop.f32.mrb[0].mxu1 }
 0x1f0   : > { %v894_v38 = vpop.f32.mrb[15].mxu0  ;;  %v899_v39 = vsel %vm309_vm0, %v892_v37, -inf  ;;  %800 = vst.msk [vmem:[#allocation3 + $0x58] sm:$0xff] %vm309_vm0, %v2254_v62  ;;  %v680_v63 = vpop.f32.mrb[1].mxu1 }
 0x1f1   : > { %900 = vmax.xlane.f32.xlu1 %v899_v39  ;;  %799 = vst.msk [vmem:[#allocation3 + $0x50] sm:$0xff] %vm309_vm0, %v680_v63  ;;  %v933_v38 = vmul.f32 2.0, %v3047_v1 }
 0x1f7   : > { %v2257_v4 = vpop.f32.mrb[2].mxu1 }
 0x1f8   : > { %802 = vst.msk [vmem:[#allocation3 + $0x68] sm:$0xff] %vm309_vm0, %v2257_v4  ;;  %v690_v6 = vpop.f32.mrb[3].mxu1 }
 0x1f9   : > { %801 = vst.msk [vmem:[#allocation3 + $0x60] sm:$0xff] %vm309_vm0, %v690_v6 }
 0x1ff   : > { %v2260_v7 = vpop.f32.mrb[4].mxu1 }
 0x200   : > { %804 = vst.msk [vmem:[#allocation3 + $0x78] sm:$0xff] %vm309_vm0, %v2260_v7  ;;  %v700_v8 = vpop.f32.mrb[5].mxu1 }
 0x201   : > { %803 = vst.msk [vmem:[#allocation3 + $0x70] sm:$0xff] %vm309_vm0, %v700_v8 }
 0x27a   : > { %v898_v46 = vpop.xlane.xlu1 %897 }
 0x27b   : > { %v902_v47 = vsub.f32 %v898_v46, %v887_v34  ;;  %v932_v34 = vmul.f32 2.0, %v3050_v2 }
 0x27d   : > { %v904_v48 = vsel %vm309_vm0, %v902_v47, -inf }
 0x27e   : > { %905 = vmax.xlane.f32.xlu0 %v904_v48  ;;  %v901_v49 = vpop.xlane.xlu1 %900 }
 0x27f   : > { %v903_v50 = vsub.f32 %v901_v49, %v892_v37 }
 0x281   : > { %v907_v51 = vsel %vm309_vm0, %v903_v50, -inf }
 0x282   : > { %908 = vmax.xlane.f32.xlu1 %v907_v51 }
 0x30b   : > { %v906_v52 = vpop.xlane.xlu0 %905 }
 0x30c   : > { %v910_v53 = vsub.f32 %v902_v47, %v906_v52 }
 0x30e   : > { %v912_v54 = vmul.f32 1.442695, %v910_v53 }
 0x30f   : > { %v909_v55 = vpop.xlane.xlu1 %908 }
 0x310   : > { %2497 = vpow2.f32 %v912_v54  ;;  %v911_v56 = vsub.f32 %v903_v50, %v909_v55 }
 0x312   : > { %v914_v57 = vmul.f32 1.442695, %v911_v56 }
 0x314   : > { %2499 = vpow2.f32 %v914_v57 }
 0x31a   : > { %v2498_v58 = vpop.eup %2497 }
 0x31b   : > { %v916_v59 = vsel %vm309_vm0, %v2498_v58, 0.0 }
 0x31c   : > { %917 = vadd.xlane.f32.xlu1 %v916_v59 }
 0x31e   : > { %v2500_v60 = vpop.eup %2499 }
 0x31f   : > { %v919_v61 = vsel %vm309_vm0, %v2500_v60, 0.0 }
 0x320   : > { %920 = vadd.xlane.f32.xlu1 %v919_v61 }
 0x353   : > { %430 = vxpose.xlu1.b32.start [1/2] (short) %v3050_v2, 128 }
 0x357   : > { %431 = vxpose.xlu1.b32.end [2/2] (short) %v3054_v3, 128 }
 0x3a9   : > { %v918_v9 = vpop.xlane.xlu1 %917 }
 0x3aa   : > { %2501 = vrcp.f32 %v918_v9 }
 0x3ad   : > { %v921_v10 = vpop.xlane.xlu1 %920 }
 0x3ae   : > { %2503 = vrcp.f32 %v921_v10 }
 0x3b4   : > { %v2502_v12 = vpop.eup %2501 }
 0x3b5   : > { %v927_v13 = vmul.f32 %v2502_v12, %v926_v11 }
 0x3b7   : > { %v929_v14 = vmul.f32 %v2498_v58, %v927_v13 }
 0x3b8   : > { %v2504_v15 = vpop.eup %2503 }
 0x3b9   : > { %2079 = vmatmul.mubr.msk.f32.vlgmr.msra.gmra.mrb[16].mxu0 %vm309_vm0, %v929_v14  ;;  %v928_v16 = vmul.f32 %v2504_v15, %v926_v11 }
 0x3ba   : > { %1011 = vmatprep.mubr.f32.mxu0 %v2792_v5 }
 0x3bb   : > { %v930_v17 = vmul.f32 %v2500_v60, %v928_v16 }
 0x3bd   : > { %2080 = vmatmul.mubr.msk.f32.gmra.mrb[18].mxu0 %vm309_vm0, %v930_v17 }
 0x3d3   : > { %v446_v18 = vpop.trf.xlu1 }
 0x3d4   : > { %2261 = vmatprep.mubr.msk.f32.mxu1 %vm309_vm0, %v446_v18 }
 0x3d7   : > { %v447_v19 = vpop.trf.xlu1 }
 0x3d8   : > { %2262 = vmatmul.mubr.msk.f32.gmra.mrb[6].mxu1 %vm309_vm0, %v447_v19 }
 0x3db   : > { %v448_v20 = vpop.trf.xlu1 }
 0x3dc   : > { %2264 = vmatprep.mubr.msk.f32.mxu1 %vm309_vm0, %v448_v20 }
 0x3df   : > { %v449_v21 = vpop.trf.xlu1 }
 0x3e0   : > { %2265 = vmatmul.mubr.msk.f32.gmra.mrb[8].mxu1 %vm309_vm0, %v449_v21 }
 0x3e3   : > { %v450_v22 = vpop.trf.xlu1 }
 0x3e4   : > { %2267 = vmatprep.mubr.msk.f32.mxu1 %vm309_vm0, %v450_v22 }
 0x3e7   : > { %v451_v23 = vpop.trf.xlu1 }
 0x3e8   : > { %2268 = vmatmul.mubr.msk.f32.gmra.mrb[10].mxu1 %vm309_vm0, %v451_v23 }
 0x3eb   : > { %v452_v5 = vpop.trf.xlu1 }
 0x3ec   : > { %2270 = vmatprep.mubr.msk.f32.mxu1 %vm309_vm0, %v452_v5 }
 0x3ef   : > { %v453_v24 = vpop.trf.xlu1 }
 0x3f0   : > { %2271 = vmatmul.mubr.msk.f32.gmra.mrb[12].mxu1 %vm309_vm0, %v453_v24 }
 0x3f3   : > { %v454_v25 = vpop.trf.xlu1 }
 0x3f4   : > { %2273 = vmatprep.mubr.msk.f32.mxu1 %vm309_vm0, %v454_v25 }
 0x3f7   : > { %v455_v26 = vpop.trf.xlu1 }
 0x3f8   : > { %2274 = vmatmul.mubr.msk.f32.gmra.mrb[14].mxu1 %vm309_vm0, %v455_v26 }
 0x3fb   : > { %v456_v27 = vpop.trf.xlu1 }
 0x3fc   : > { %2276 = vmatprep.mubr.msk.f32.mxu1 %vm309_vm0, %v456_v27 }
 0x3ff   : > { %v457_v28 = vpop.trf.xlu1 }
 0x400   : > { %2277 = vmatmul.mubr.msk.f32.gmra.mrb[16].mxu1 %vm309_vm0, %v457_v28 }
 0x403   : > { %v458_v29 = vpop.trf.xlu1 }
 0x404   : > { %2279 = vmatprep.mubr.msk.f32.mxu1 %vm309_vm0, %v458_v29 }
 0x407   : > { %v459_v30 = vpop.trf.xlu1 }
 0x408   : > { %2280 = vmatmul.mubr.msk.f32.gmra.mrb[18].mxu1 %vm309_vm0, %v459_v30 }
 0x40b   : > { %v460_v31 = vpop.trf.xlu1 }
 0x40c   : > { %2282 = vmatprep.mubr.msk.f32.mxu1 %vm309_vm0, %v460_v31 }
 0x40f   : > { %v461_v32 = vpop.trf.xlu1 }
 0x410   : > { %2283 = vmatmul.mubr.msk.f32.gmra.mrb[20].mxu1 %vm309_vm0, %v461_v32 }
 0x48c   : > { %v1007_v35 = vpop.f32.mrb[16].mxu0 }
 0x48d   : > { %v1008_v36 = vadd.f32 %v1007_v35, %v931_v33  ;;  %v1009_v37 = vpop.f32.mrb[17].mxu0 }
 0x48e   : > { %v1010_v39 = vadd.f32 %v1009_v37, %v932_v34 }
 0x48f   : > { %1018 = vst [vmem:[#allocation4] sm:$0xff] %v1008_v36 }
 0x490   : > { %1019 = vst [vmem:[#allocation4 + $0x8] sm:$0xff] %v1010_v39  ;;  %v1013_v41 = vpop.f32.mrb[18].mxu0 }
 0x491   : > { %v1014_v42 = vadd.f32 %v1013_v41, %v933_v38  ;;  %v1015_v43 = vpop.f32.mrb[19].mxu0 }
 0x492   : > { %v1016_v44 = vadd.f32 %v1015_v43, %v934_v40 }
 0x493   : > { %1020 = vst [vmem:[#allocation4 + $0x10] sm:$0xff] %v1014_v42 }
 0x494   : > { %1021 = vst [vmem:[#allocation4 + $0x18] sm:$0xff] %v1016_v44 }
 0x4ab   : > { %v2263_v45 = vpop.f32.mrb[6].mxu1 }
 0x4ac   : > { %806 = vst.msk [vmem:[#allocation3 + $0x88] sm:$0xff] %vm309_vm0, %v2263_v45  ;;  %v710_v0 = vpop.f32.mrb[7].mxu1 }
 0x4ad   : > { %805 = vst.msk [vmem:[#allocation3 + $0x80] sm:$0xff] %vm309_vm0, %v710_v0 }
 0x4b3   : > { %v2266_v2 = vpop.f32.mrb[8].mxu1 }
 0x4b4   : > { %808 = vst.msk [vmem:[#allocation3 + $0x98] sm:$0xff] %vm309_vm0, %v2266_v2  ;;  %v720_v1 = vpop.f32.mrb[9].mxu1 }
 0x4b5   : > { %807 = vst.msk [vmem:[#allocation3 + $0x90] sm:$0xff] %vm309_vm0, %v720_v1 }
 0x4bb   : > { %v2269_v3 = vpop.f32.mrb[10].mxu1 }
 0x4bc   : > { %810 = vst.msk [vmem:[#allocation3 + $0xa8] sm:$0xff] %vm309_vm0, %v2269_v3  ;;  %v730_v46 = vpop.f32.mrb[11].mxu1 }
 0x4bd   : > { %809 = vst.msk [vmem:[#allocation3 + $0xa0] sm:$0xff] %vm309_vm0, %v730_v46 }
 0x4c3   : > { %v2272_v47 = vpop.f32.mrb[12].mxu1 }
 0x4c4   : > { %812 = vst.msk [vmem:[#allocation3 + $0xb8] sm:$0xff] %vm309_vm0, %v2272_v47  ;;  %v740_v48 = vpop.f32.mrb[13].mxu1 }
 0x4c5   : > { %811 = vst.msk [vmem:[#allocation3 + $0xb0] sm:$0xff] %vm309_vm0, %v740_v48 }
 0x4cb   : > { %v2275_v49 = vpop.f32.mrb[14].mxu1 }
 0x4cc   : > { %814 = vst.msk [vmem:[#allocation3 + $0xc8] sm:$0xff] %vm309_vm0, %v2275_v49  ;;  %v750_v50 = vpop.f32.mrb[15].mxu1 }
 0x4cd   : > { %813 = vst.msk [vmem:[#allocation3 + $0xc0] sm:$0xff] %vm309_vm0, %v750_v50 }
 0x4d3   : > { %v2278_v51 = vpop.f32.mrb[16].mxu1 }
 0x4d4   : > { %816 = vst.msk [vmem:[#allocation3 + $0xd8] sm:$0xff] %vm309_vm0, %v2278_v51  ;;  %v760_v52 = vpop.f32.mrb[17].mxu1 }
 0x4d5   : > { %815 = vst.msk [vmem:[#allocation3 + $0xd0] sm:$0xff] %vm309_vm0, %v760_v52 }
 0x4db   : > { %v2281_v53 = vpop.f32.mrb[18].mxu1 }
 0x4dc   : > { %818 = vst.msk [vmem:[#allocation3 + $0xe8] sm:$0xff] %vm309_vm0, %v2281_v53  ;;  %v770_v54 = vpop.f32.mrb[19].mxu1 }
 0x4dd   : > { %817 = vst.msk [vmem:[#allocation3 + $0xe0] sm:$0xff] %vm309_vm0, %v770_v54 }
 0x4e3   : > { %v2284_v55 = vpop.f32.mrb[20].mxu1 }
 0x4e4   : > { %820 = vst.msk [vmem:[#allocation3 + $0xf8] sm:$0xff] %vm309_vm0, %v2284_v55  ;;  %v780_v56 = vpop.f32.mrb[21].mxu1 }
 0x4e5   : > { %819 = vst.msk [vmem:[#allocation3 + $0xf0] sm:$0xff] %vm309_vm0, %v780_v56 }
 0x4e6 PF: > { %s2081_s24 = sshll.u32 %s2770_s9, 7  ;;  %v2793_v57 = vmov 0.0|0.0   ;;  %vm2794_vm2 = vmmov 0   ;;  %v2795_v58 = vmov 0.0   ;;  %v1029_v62 = vld [vmem:[%s3420_s2] sm:$0x3] }
 0x4e7   : > { %2317 = vmatprep.subr.bf16.mxu0 %v2793_v57  ;;  %s3156_s22 = sshra.s32 %s2081_s24, 7  ;;  %2289 = vmatprep.mubr.msk.f32.mxu0 %vm2794_vm2, %v2795_v58  ;;  %vm1030_vm3 = vcmask 130048   ;;  %v2084_v63 = vld.sshfl [vmem:[#allocation2] sm:$0x33 pattern:$0x76325410] }
 0x4e8   : > { %s2082_s3 = sshll.u32 %s3156_s22, 3  ;;  %1264 = vmatprep.mubr.f32.mxu1 %v2795_v58  ;;  %vm1195_vm4 = vcmask 1041408   ;;  %v1145_v4 = vcombine.high %v2084_v63, %v2084_v63  ;;  %vm1146_vm5 = vcmask 15360   ;;  %v1601_v5 = vld [vmem:[#allocation3 + $0x80] sm:$0xff]  ;;  %v1602_v24 = vld [vmem:[#allocation3 + $0x88] sm:$0xff]  ;;  %v1603_v28 = vld [vmem:[#allocation3 + $0x90] sm:$0xff] }
 0x4e9   : > { %s1026_s29 = scalar_lea.vmem %s3027_s13, %s2082_s3 [#allocation7]  ;;  %v1585_v25 = vld [vmem:[#allocation3] sm:$0xff]  ;;  %v2320_v26 = vpack.c.bf16 %v1602_v24, %v1601_v5  ;;  %v1586_v27 = vld [vmem:[#allocation3 + $0x8] sm:$0xff]  ;;  %v1604_v29 = vld [vmem:[#allocation3 + $0x98] sm:$0xff]  ;;  %s1811_s15 = scalar_lea.vmem [#allocation4], %s2082_s3 }
 0x4ea   : > { %v1027_v59 = vld [vmem:[%s1026_s29] sm:$0xff]  ;;  %v1028_v60 = vld [vmem:[%s1026_s29 + $0x10] sm:$0xff]  ;;  %2085 = vmatprep.subr.msk.mxu1 %vm1195_vm4, %v1145_v4  ;;  %v2322_v30 = vpack.c.bf16 %v1586_v27, %v1585_v25  ;;  %v2324_v31 = vpack.c.bf16 %v1604_v29, %v1603_v28  ;;  %s2107_s29 = sshll.u32 %s2774_s0, 2  ;;  %s3463_s7 = sld [smem:[#allocation19_spill]] }
 0x4eb   : > { %v2318_v61 = vpack.c.bf16 %v1028_v60, %v1027_v59  ;;  %2086 = vmatpush1.msk.msra.mxu1 %vm1195_vm4, %v2084_v63  ;;  %v1587_v32 = vld [vmem:[#allocation3 + $0x10] sm:$0xff]  ;;  %v1588_v33 = vld [vmem:[#allocation3 + $0x18] sm:$0xff]  ;;  %v1605_v34 = vld [vmem:[#allocation3 + $0xa0] sm:$0xff]  ;;  %s1927_s22 = sadd.s32 %s2770_s9, %s2107_s29  ;;  %s1930_s26 = sshll.u32 %s3040_s21, 4  ;;  %s3351_s26 = int_to_ptr.vmem [resolvable:$true] %s1930_s26 }
 0x4ec   : > { %v1606_v35 = vld [vmem:[#allocation3 + $0xa8] sm:$0xff]  ;;  %2358 = vmatprep.subr.bf16.mxu1 %v2320_v26  ;;  %v2326_v36 = vpack.c.bf16 %v1588_v33, %v1587_v32  ;;  %v1589_v38 = vld [vmem:[#allocation3 + $0x20] sm:$0xff]  ;;  %v1607_v40 = vld [vmem:[#allocation3 + $0xb0] sm:$0xff]  ;;  %s2108_s3 = sshll.u32 %s1927_s22, 7  ;;  %s3464_s19 = sld [smem:[#allocation23_spill]] }
 0x4ed   : > { %2319 = vmatpush3.bf16.msra.mxu0 %v2318_v61  ;;  %v2328_v37 = vpack.c.bf16 %v1606_v35, %v1605_v34  ;;  %v1590_v39 = vld [vmem:[#allocation3 + $0x28] sm:$0xff]  ;;  %v1608_v41 = vld [vmem:[#allocation3 + $0xb8] sm:$0xff]  ;;  %v1591_v44 = vld [vmem:[#allocation3 + $0x30] sm:$0xff]  ;;  %s3357_s9 = scalar_lea.sflag [#allocation9], %s296_s12  ;;  %s2660_s0 = scalar_lea.vmem %s3351_s26, 256 }
 0x4ee   : > { %2321 = vmatprep.subr.bf16.mxu0 %v2320_v26  ;;  %v2330_v42 = vpack.c.bf16 %v1590_v39, %v1589_v38  ;;  %v2332_v43 = vpack.c.bf16 %v1608_v41, %v1607_v40  ;;  %v1592_v45 = vld [vmem:[#allocation3 + $0x38] sm:$0xff]  ;;  %v1609_v56 = vld [vmem:[#allocation3 + $0xc0] sm:$0xff]  ;;  %v1610_v57 = vld [vmem:[#allocation3 + $0xc8] sm:$0xff]  ;;  %p2661_p4 = scmp.ne.s32.totalorder %s3351_s26, %s2660_s0  ;;  %s2797_s18 = smov [#allocation12]  }
 0x4ef   : > { %v2334_v0 = vpack.c.bf16 %v1592_v45, %v1591_v44  ;;  %v2336_v59 = vpack.c.bf16 %v1610_v57, %v1609_v56  ;;  %v1593_v60 = vld [vmem:[#allocation3 + $0x40] sm:$0xff]  ;;  %v1594_v61 = vld [vmem:[#allocation3 + $0x48] sm:$0xff]  ;;  %v1615_v5 = vld [vmem:[#allocation3 + $0xf0] sm:$0xff]  ;;  %s2664_s25 = sshll.u32 %s2797_s18, 4  ;;  %s2665_s25 = int_to_ptr.vmem [resolvable:$false] %s2664_s25 }
 0x4f0   : > { %2290 = vmatmul.mubr.msk.f32.vlgmr.msra.gmra.mrb[0].mxu0 %vm1030_vm3, %v1029_v62  ;;  %v2338_v63 = vpack.c.bf16 %v1594_v61, %v1593_v60  ;;  %v1616_v24 = vld [vmem:[#allocation3 + $0xf8] sm:$0xff]  ;;  %v1599_v27 = vld [vmem:[#allocation3 + $0x70] sm:$0xff]  ;;  %p3465_p2 = scmp.ne.s32.totalorder %s3463_s7, 0  ;;  %p2667_p6 = scmp.lt.s32.totalorder %s3351_s26, %s2665_s25 }
 0x4f1   : > { %2323 = vmatpush3.bf16.msra.mxu0 %v2322_v30  ;;  %v2348_v26 = vpack.c.bf16 %v1616_v24, %v1615_v5  ;;  %v1600_v28 = vld [vmem:[#allocation3 + $0x78] sm:$0xff] }
 0x4f2   : > { %2325 = vmatprep.subr.bf16.mxu0 %v2324_v31  ;;  %s3349_s16 = scalar_lea.hbm %s3464_s19, %s2108_s3  ;;  %p2662_p12 = pnand %p2661_p4, %p3465_p2 }
 0x4f4   : > { %p2663_p3 = pneg %p2662_p12 }
 0x4f5   : > { %2327 = vmatpush3.bf16.msra.mxu0 %v2326_v36 }
 0x4f6   : > { %2329 = vmatprep.subr.bf16.mxu0 %v2328_v37 }
 0x4f9   : > { %2331 = vmatpush3.bf16.msra.mxu0 %v2330_v42 }
 0x4fa   : > { %2333 = vmatprep.subr.bf16.mxu0 %v2332_v43 }
 0x4fd   : > { %2335 = vmatpush3.bf16.msra.mxu0 %v2334_v0 }
 0x4fe   : > { %2337 = vmatprep.subr.bf16.mxu0 %v2336_v59 }
 0x501   : > { %2339 = vmatpush3.bf16.msra.mxu0 %v2338_v63 }
 0x5c3   : > { %v1100_v6 = vpop.f32.mrb[0].mxu0 }
 0x5c4   : > { %1105 = vxpose.xlu0.b32.start.end [1/1] (short) %v1100_v6, 128  ;;  %v2291_v7 = vpop.f32.mrb[1].mxu0  ;;  %v1611_v6 = vld [vmem:[#allocation3 + $0xd0] sm:$0xff] }
 0x5c5   : > { %v1612_v7 = vld [vmem:[#allocation3 + $0xd8] sm:$0xff] }
 0x644   : > { %v1121_v8 = vpop.trf.xlu0 }
 0x645   : > { %2087 = vmatmul.mubr.msk.f32.vlgmr.msra.gmra.mrb[0].mxu1 %vm1146_vm5, %v1121_v8 }
 0x646   : > { %1270 = vmatprep.mubr.f32.mxu1 %v2795_v58  ;;  %2366 = vmatpush3.bf16.msra.mxu1 %v2322_v30  ;;  %v2350_v30 = vpack.c.bf16 %v1600_v28, %v1599_v27 }
 0x647   : > { %2359 = vmatprep.subr.bf16.mxu1 %v2324_v31 }
 0x648   : > { %v1122_v9 = vpop.trf.xlu0 }
 0x649   : > { %2088 = vmatmul.mubr.msk.f32.gmra.mrb[2].mxu1 %vm1146_vm5, %v1122_v9  ;;  %v2340_v9 = vpack.c.bf16 %v1612_v7, %v1611_v6 }
 0x64a   : > { %1276 = vmatprep.mubr.f32.mxu1 %v2795_v58  ;;  %2367 = vmatpush3.bf16.msra.mxu1 %v2326_v36 }
 0x64b   : > { %2360 = vmatprep.subr.bf16.mxu1 %v2328_v37  ;;  %2341 = vmatprep.subr.bf16.mxu0 %v2340_v9 }
 0x64c   : > { %v1123_v10 = vpop.trf.xlu0 }
 0x64d   : > { %2089 = vmatmul.mubr.msk.f32.gmra.mrb[4].mxu1 %vm1146_vm5, %v1123_v10  ;;  %v1595_v10 = vld [vmem:[#allocation3 + $0x50] sm:$0xff] }
 0x64e   : > { %1282 = vmatprep.mubr.f32.mxu1 %v2795_v58  ;;  %2368 = vmatpush3.bf16.msra.mxu1 %v2330_v42 }
 0x64f   : > { %2361 = vmatprep.subr.bf16.mxu1 %v2332_v43 }
 0x650   : > { %v1124_v11 = vpop.trf.xlu0 }
 0x651   : > { %2090 = vmatmul.mubr.msk.f32.gmra.mrb[6].mxu1 %vm1146_vm5, %v1124_v11  ;;  %v1596_v11 = vld [vmem:[#allocation3 + $0x58] sm:$0xff] }
 0x652   : > { %1288 = vmatprep.mubr.f32.mxu1 %v2795_v58  ;;  %2369 = vmatpush3.bf16.msra.mxu1 %v2334_v0 }
 0x653   : > { %2362 = vmatprep.subr.bf16.mxu1 %v2336_v59 }
 0x654   : > { %v1125_v12 = vpop.trf.xlu0 }
 0x655   : > { %2091 = vmatmul.mubr.msk.f32.gmra.mrb[8].mxu1 %vm1146_vm5, %v1125_v12 }
 0x656   : > { %1294 = vmatprep.mubr.f32.mxu1 %v2795_v58  ;;  %2370 = vmatpush3.bf16.msra.mxu1 %v2338_v63 }
 0x657   : > { %2363 = vmatprep.subr.bf16.mxu1 %v2340_v9 }
 0x658   : > { %v1126_v13 = vpop.trf.xlu0 }
 0x659   : > { %2092 = vmatmul.mubr.msk.f32.gmra.mrb[10].mxu1 %vm1146_vm5, %v1126_v13  ;;  %v2342_v13 = vpack.c.bf16 %v1596_v11, %v1595_v10 }
 0x65a   : > { %1300 = vmatprep.mubr.f32.mxu1 %v2795_v58 }
 0x65b   : > { %2343 = vmatpush3.bf16.msra.mxu0 %v2342_v13  ;;  %2371 = vmatpush3.bf16.msra.mxu1 %v2342_v13 }
 0x65c   : > { %v1127_v14 = vpop.trf.xlu0 }
 0x65d   : > { %2093 = vmatmul.mubr.msk.f32.gmra.mrb[12].mxu1 %vm1146_vm5, %v1127_v14 }
 0x65e   : > { %1306 = vmatprep.mubr.f32.mxu1 %v2795_v58 }
 0x660   : > { %v1128_v15 = vpop.trf.xlu0 }
 0x661   : > { %2094 = vmatmul.mubr.msk.f32.gmra.mrb[14].mxu1 %vm1146_vm5, %v1128_v15  ;;  %v1613_v15 = vld [vmem:[#allocation3 + $0xe0] sm:$0xff] }
 0x662   : > { %1312 = vmatprep.mubr.f32.mxu1 %v2795_v58 }
 0x664   : > { %v1129_v16 = vpop.trf.xlu0 }
 0x665   : > { %2095 = vmatmul.mubr.msk.f32.gmra.mrb[16].mxu1 %vm1146_vm5, %v1129_v16  ;;  %v1614_v16 = vld [vmem:[#allocation3 + $0xe8] sm:$0xff] }
 0x666   : > { %1318 = vmatprep.mubr.f32.mxu1 %v2795_v58 }
 0x668   : > { %v1130_v17 = vpop.trf.xlu0 }
 0x669   : > { %2096 = vmatmul.mubr.msk.f32.gmra.mrb[18].mxu1 %vm1146_vm5, %v1130_v17 }
 0x66a   : > { %1324 = vmatprep.mubr.f32.mxu1 %v2795_v58 }
 0x66c   : > { %v1131_v18 = vpop.trf.xlu0 }
 0x66d   : > { %2097 = vmatmul.mubr.msk.f32.gmra.mrb[20].mxu1 %vm1146_vm5, %v1131_v18  ;;  %v2344_v18 = vpack.c.bf16 %v1614_v16, %v1613_v15 }
 0x66e   : > { %1330 = vmatprep.mubr.f32.mxu1 %v2795_v58 }
 0x66f   : > { %2345 = vmatprep.subr.bf16.mxu0 %v2344_v18  ;;  %2364 = vmatprep.subr.bf16.mxu1 %v2344_v18 }
 0x670   : > { %v1132_v19 = vpop.trf.xlu0 }
 0x671   : > { %2098 = vmatmul.mubr.msk.f32.gmra.mrb[22].mxu1 %vm1146_vm5, %v1132_v19  ;;  %v1597_v19 = vld [vmem:[#allocation3 + $0x60] sm:$0xff] }
 0x672   : > { %1336 = vmatprep.mubr.f32.mxu1 %v2795_v58 }
 0x674   : > { %v1133_v20 = vpop.trf.xlu0 }
 0x675   : > { %2099 = vmatmul.mubr.msk.f32.gmra.mrb[24].mxu1 %vm1146_vm5, %v1133_v20  ;;  %v1598_v20 = vld [vmem:[#allocation3 + $0x68] sm:$0xff] }
 0x676   : > { %1342 = vmatprep.mubr.f32.mxu1 %v2795_v58 }
 0x678   : > { %v1134_v21 = vpop.trf.xlu0 }
 0x679   : > { %2100 = vmatmul.mubr.msk.f32.gmra.mrb[26].mxu1 %vm1146_vm5, %v1134_v21 }
 0x67a   : > { %1348 = vmatprep.mubr.f32.mxu1 %v2795_v58 }
 0x67c   : > { %v1135_v22 = vpop.trf.xlu0 }
 0x67d   : > { %2101 = vmatmul.mubr.msk.f32.gmra.mrb[28].mxu1 %vm1146_vm5, %v1135_v22  ;;  %v2346_v22 = vpack.c.bf16 %v1598_v20, %v1597_v19 }
 0x67e   : > { %1354 = vmatprep.mubr.f32.mxu1 %v2795_v58 }
 0x67f   : > { %2347 = vmatpush3.bf16.msra.mxu0 %v2346_v22  ;;  %2372 = vmatpush3.bf16.msra.mxu1 %v2346_v22 }
 0x680   : > { %v1136_v23 = vpop.trf.xlu0  ;;  %2349 = vmatprep.subr.bf16.mxu0 %v2348_v26  ;;  %2365 = vmatprep.subr.bf16.mxu1 %v2348_v26 }
 0x681   : > { %2102 = vmatmul.mubr.msk.f32.gmra.mrb[30].mxu1 %vm1146_vm5, %v1136_v23 }
 0x683   : > { %2351 = vmatpush3.bf16.msra.mxu0 %v2350_v30  ;;  %2373 = vmatpush3.bf16.msra.mxu1 %v2350_v30 }
 0x718   : > { %v3199_v2 = vpop.f32.mrb[0].mxu1 }
 0x719   : > { %v3201_v1 = vpop.f32.mrb[1].mxu1 }
 0x71a   : > { %v1361_v3 = vmax.f32 %v3199_v2, %v3201_v1 }
 0x71c   : > { %1362 = vmax.xlane.f32.xlu0 %v1361_v3  ;;  %v3205_v46 = vpop.f32.mrb[2].mxu1 }
 0x71d   : > { %v3207_v47 = vpop.f32.mrb[3].mxu1 }
 0x71e   : > { %v1364_v48 = vmax.f32 %v3205_v46, %v3207_v47 }
 0x720   : > { %1365 = vmax.xlane.f32.xlu1 %v1364_v48  ;;  %v3211_v49 = vpop.f32.mrb[4].mxu1 }
 0x721   : > { %v3213_v50 = vpop.f32.mrb[5].mxu1 }
 0x722   : > { %v1367_v51 = vmax.f32 %v3211_v49, %v3213_v50 }
 0x724   : > { %1368 = vmax.xlane.f32.xlu1 %v1367_v51  ;;  %v3217_v52 = vpop.f32.mrb[6].mxu1 }
 0x725   : > { %v3219_v53 = vpop.f32.mrb[7].mxu1 }
 0x726   : > { %v1370_v54 = vmax.f32 %v3217_v52, %v3219_v53 }
 0x728   : > { %1371 = vmax.xlane.f32.xlu1 %v1370_v54  ;;  %v3223_v55 = vpop.f32.mrb[8].mxu1 }
 0x729   : > { %v3225_v58 = vpop.f32.mrb[9].mxu1 }
 0x72a   : > { %v1373_v62 = vmax.f32 %v3223_v55, %v3225_v58 }
 0x72c   : > { %1374 = vmax.xlane.f32.xlu1 %v1373_v62  ;;  %v3229_v4 = vpop.f32.mrb[10].mxu1 }
 0x72d   : > { %v3231_v8 = vpop.f32.mrb[11].mxu1 }
 0x72e   : > { %v1376_v12 = vmax.f32 %v3229_v4, %v3231_v8 }
 0x730   : > { %1377 = vmax.xlane.f32.xlu1 %v1376_v12  ;;  %v3235_v14 = vpop.f32.mrb[12].mxu1 }
 0x731   : > { %v3237_v17 = vpop.f32.mrb[13].mxu1 }
 0x732   : > { %v1379_v21 = vmax.f32 %v3235_v14, %v3237_v17 }
 0x734   : > { %1380 = vmax.xlane.f32.xlu1 %v1379_v21  ;;  %v3241_v23 = vpop.f32.mrb[14].mxu1 }
 0x735   : > { %v3243_v25 = vpop.f32.mrb[15].mxu1 }
 0x736   : > { %v1382_v29 = vmax.f32 %v3241_v23, %v3243_v25 }
 0x738   : > { %1383 = vmax.xlane.f32.xlu1 %v1382_v29  ;;  %v3247_v31 = vpop.f32.mrb[16].mxu1 }
 0x739   : > { %v3249_v32 = vpop.f32.mrb[17].mxu1 }
 0x73a   : > { %v1385_v33 = vmax.f32 %v3247_v31, %v3249_v32 }
 0x73c   : > { %1386 = vmax.xlane.f32.xlu1 %v1385_v33  ;;  %v3253_v34 = vpop.f32.mrb[18].mxu1 }
 0x73d   : > { %v3255_v35 = vpop.f32.mrb[19].mxu1 }
 0x73e   : > { %v1388_v36 = vmax.f32 %v3253_v34, %v3255_v35 }
 0x740   : > { %1389 = vmax.xlane.f32.xlu1 %v1388_v36  ;;  %v3259_v37 = vpop.f32.mrb[20].mxu1 }
 0x741   : > { %v3261_v38 = vpop.f32.mrb[21].mxu1 }
 0x742   : > { %v1391_v39 = vmax.f32 %v3259_v37, %v3261_v38 }
 0x744   : > { %1392 = vmax.xlane.f32.xlu1 %v1391_v39  ;;  %v3265_v40 = vpop.f32.mrb[22].mxu1 }
 0x745   : > { %v3267_v41 = vpop.f32.mrb[23].mxu1 }
 0x746   : > { %v1394_v42 = vmax.f32 %v3265_v40, %v3267_v41 }
 0x748   : > { %1395 = vmax.xlane.f32.xlu1 %v1394_v42  ;;  %v3271_v43 = vpop.f32.mrb[24].mxu1 }
 0x749   : > { %v3273_v44 = vpop.f32.mrb[25].mxu1 }
 0x74a   : > { %v1397_v45 = vmax.f32 %v3271_v43, %v3273_v44 }
 0x74c   : > { %1398 = vmax.xlane.f32.xlu1 %v1397_v45  ;;  %v3277_v0 = vpop.f32.mrb[26].mxu1 }
 0x74d   : > { %v3279_v3 = vpop.f32.mrb[27].mxu1 }
 0x74e   : > { %v1400_v48 = vmax.f32 %v3277_v0, %v3279_v3 }
 0x750   : > { %1401 = vmax.xlane.f32.xlu1 %v1400_v48  ;;  %v3283_v51 = vpop.f32.mrb[28].mxu1 }
 0x751   : > { %v3285_v54 = vpop.f32.mrb[29].mxu1 }
 0x752   : > { %v1403_v56 = vmax.f32 %v3283_v51, %v3285_v54 }
 0x754   : > { %1404 = vmax.xlane.f32.xlu1 %v1403_v56  ;;  %v3289_v57 = vpop.f32.mrb[30].mxu1 }
 0x755   : > { %v3291_v59 = vpop.f32.mrb[31].mxu1 }
 0x756   : > { %v1406_v60 = vmax.f32 %v3289_v57, %v3291_v59 }
 0x758   : > { %1407 = vmax.xlane.f32.xlu1 %v1406_v60 }
 0x7a9   : > { %v1363_v61 = vpop.xlane.xlu0 %1362 }
 0x7aa   : > { %v1409_v62 = vsub.f32 %v3199_v2, %v1363_v61  ;;  %v1410_v63 = vsub.f32 %v3201_v1, %v1363_v61 }
 0x7ac   : > { %v1441_v6 = vmul.f32 1.442695, %v1409_v62  ;;  %v1443_v7 = vmul.f32 1.442695, %v1410_v63 }
 0x7ad   : > { %v1366_v9 = vpop.xlane.xlu1 %1365 }
 0x7ae   : > { %2506 = vpow2.f32 %v1441_v6  ;;  %v1411_v10 = vsub.f32 %v3205_v46, %v1366_v9  ;;  %v1412_v11 = vsub.f32 %v3207_v47, %v1366_v9 }
 0x7af   : > { %2508 = vpow2.f32 %v1443_v7 }
 0x7b0   : > { %v1445_v12 = vmul.f32 1.442695, %v1411_v10  ;;  %v1447_v13 = vmul.f32 1.442695, %v1412_v11 }
 0x7b1   : > { %v1369_v15 = vpop.xlane.xlu1 %1368 }
 0x7b2   : > { %2510 = vpow2.f32 %v1445_v12  ;;  %v1413_v16 = vsub.f32 %v3211_v49, %v1369_v15  ;;  %v1414_v18 = vsub.f32 %v3213_v50, %v1369_v15 }
 0x7b3   : > { %2512 = vpow2.f32 %v1447_v13 }
 0x7b4   : > { %v1449_v2 = vmul.f32 1.442695, %v1413_v16  ;;  %v1451_v1 = vmul.f32 1.442695, %v1414_v18 }
 0x7b5   : > { %v1372_v19 = vpop.xlane.xlu1 %1371 }
 0x7b6   : > { %2514 = vpow2.f32 %v1449_v2  ;;  %v1415_v20 = vsub.f32 %v3217_v52, %v1372_v19  ;;  %v1416_v46 = vsub.f32 %v3219_v53, %v1372_v19 }
 0x7b7   : > { %2516 = vpow2.f32 %v1451_v1 }
 0x7b8   : > { %v2507_v47 = vpop.eup %2506  ;;  %v1453_v21 = vmul.f32 1.442695, %v1415_v20  ;;  %v1455_v22 = vmul.f32 1.442695, %v1416_v46 }
 0x7b9   : > { %v2509_v5 = vpop.eup %2508  ;;  %v1375_v24 = vpop.xlane.xlu1 %1374 }
 0x7ba   : > { %2518 = vpow2.f32 %v1453_v21  ;;  %v1417_v49 = vsub.f32 %v3223_v55, %v1375_v24  ;;  %v1418_v50 = vsub.f32 %v3225_v58, %v1375_v24  ;;  %1681 = vmatprep.mubr.f32.mxu0 %v2509_v5  ;;  %v1505_v26 = vadd.f32 %v2509_v5, %v2507_v47 }
 0x7bb   : > { %2520 = vpow2.f32 %v1455_v22  ;;  %1682 = vmatmul.mubr.f32.vlgmr.msra.gmra.mrb[2].mxu0 %v2507_v47 }
 0x7bc   : > { %v2511_v27 = vpop.eup %2510  ;;  %v1457_v28 = vmul.f32 1.442695, %v1417_v49  ;;  %v1459_v52 = vmul.f32 1.442695, %v1418_v50  ;;  %1506 = vadd.xlane.f32.xlu1 %v1505_v26 }
 0x7bd   : > { %v2513_v53 = vpop.eup %2512  ;;  %v1378_v29 = vpop.xlane.xlu1 %1377 }
 0x7be   : > { %2522 = vpow2.f32 %v1457_v28  ;;  %v1419_v30 = vsub.f32 %v3229_v4, %v1378_v29  ;;  %v1420_v33 = vsub.f32 %v3231_v8, %v1378_v29  ;;  %1686 = vmatprep.mubr.f32.mxu0 %v2513_v53  ;;  %v1508_v36 = vadd.f32 %v2513_v53, %v2511_v27 }
 0x7bf   : > { %2524 = vpow2.f32 %v1459_v52  ;;  %1687 = vmatmul.mubr.f32.gmra.mrb[4].mxu0 %v2511_v27 }
 0x7c0   : > { %v2515_v55 = vpop.eup %2514  ;;  %v1461_v58 = vmul.f32 1.442695, %v1419_v30  ;;  %v1463_v39 = vmul.f32 1.442695, %v1420_v33  ;;  %1509 = vadd.xlane.f32.xlu1 %v1508_v36 }
 0x7c1   : > { %v2517_v42 = vpop.eup %2516  ;;  %v1381_v45 = vpop.xlane.xlu1 %1380 }
 0x7c2   : > { %2526 = vpow2.f32 %v1461_v58  ;;  %v1421_v48 = vsub.f32 %v3235_v14, %v1381_v45  ;;  %v1422_v56 = vsub.f32 %v3237_v17, %v1381_v45  ;;  %1691 = vmatprep.mubr.f32.mxu0 %v2517_v42  ;;  %v1511_v60 = vadd.f32 %v2517_v42, %v2515_v55 }
 0x7c3   : > { %2528 = vpow2.f32 %v1463_v39  ;;  %1692 = vmatmul.mubr.f32.gmra.mrb[6].mxu0 %v2515_v55 }
 0x7c4   : > { %v2519_v4 = vpop.eup %2518  ;;  %v1465_v8 = vmul.f32 1.442695, %v1421_v48  ;;  %v1467_v61 = vmul.f32 1.442695, %v1422_v56  ;;  %1512 = vadd.xlane.f32.xlu1 %v1511_v60 }
 0x7c5   : > { %v2521_v62 = vpop.eup %2520  ;;  %v1384_v63 = vpop.xlane.xlu1 %1383 }
 0x7c6   : > { %2530 = vpow2.f32 %v1465_v8  ;;  %v1423_v6 = vsub.f32 %v3241_v23, %v1384_v63  ;;  %v1424_v7 = vsub.f32 %v3243_v25, %v1384_v63  ;;  %1696 = vmatprep.mubr.f32.mxu0 %v2521_v62  ;;  %v1514_v9 = vadd.f32 %v2521_v62, %v2519_v4 }
 0x7c7   : > { %2532 = vpow2.f32 %v1467_v61  ;;  %1697 = vmatmul.mubr.f32.gmra.mrb[8].mxu0 %v2519_v4 }
 0x7c8   : > { %v2523_v14 = vpop.eup %2522  ;;  %v1469_v17 = vmul.f32 1.442695, %v1423_v6  ;;  %v1471_v10 = vmul.f32 1.442695, %v1424_v7  ;;  %1515 = vadd.xlane.f32.xlu1 %v1514_v9 }
 0x7c9   : > { %v2525_v11 = vpop.eup %2524  ;;  %v1387_v12 = vpop.xlane.xlu1 %1386 }
 0x7ca   : > { %2534 = vpow2.f32 %v1469_v17  ;;  %v1425_v13 = vsub.f32 %v3247_v31, %v1387_v12  ;;  %v1426_v15 = vsub.f32 %v3249_v32, %v1387_v12  ;;  %1701 = vmatprep.mubr.f32.mxu0 %v2525_v11  ;;  %v1517_v16 = vadd.f32 %v2525_v11, %v2523_v14 }
 0x7cb   : > { %2536 = vpow2.f32 %v1471_v10  ;;  %1702 = vmatmul.mubr.f32.gmra.mrb[10].mxu0 %v2523_v14 }
 0x7cc   : > { %v2527_v23 = vpop.eup %2526  ;;  %v1473_v25 = vmul.f32 1.442695, %v1425_v13  ;;  %v1475_v18 = vmul.f32 1.442695, %v1426_v15  ;;  %1518 = vadd.xlane.f32.xlu1 %v1517_v16 }
 0x7cd   : > { %v2529_v2 = vpop.eup %2528  ;;  %v1390_v1 = vpop.xlane.xlu1 %1389 }
 0x7ce   : > { %2538 = vpow2.f32 %v1473_v25  ;;  %v1427_v19 = vsub.f32 %v3253_v34, %v1390_v1  ;;  %v1428_v20 = vsub.f32 %v3255_v35, %v1390_v1  ;;  %1706 = vmatprep.mubr.f32.mxu0 %v2529_v2  ;;  %v1520_v46 = vadd.f32 %v2529_v2, %v2527_v23 }
 0x7cf   : > { %2540 = vpow2.f32 %v1475_v18  ;;  %1707 = vmatmul.mubr.f32.gmra.mrb[12].mxu0 %v2527_v23 }
 0x7d0   : > { %v2531_v31 = vpop.eup %2530  ;;  %v1477_v32 = vmul.f32 1.442695, %v1427_v19  ;;  %v1479_v47 = vmul.f32 1.442695, %v1428_v20  ;;  %1521 = vadd.xlane.f32.xlu1 %v1520_v46 }
 0x7d1   : > { %v2533_v21 = vpop.eup %2532  ;;  %v1393_v22 = vpop.xlane.xlu1 %1392 }
 0x7d2   : > { %2542 = vpow2.f32 %v1477_v32  ;;  %v1429_v5 = vsub.f32 %v3259_v37, %v1393_v22  ;;  %v1430_v24 = vsub.f32 %v3261_v38, %v1393_v22  ;;  %1711 = vmatprep.mubr.f32.mxu0 %v2533_v21  ;;  %v1523_v49 = vadd.f32 %v2533_v21, %v2531_v31 }
 0x7d3   : > { %2544 = vpow2.f32 %v1479_v47  ;;  %1712 = vmatmul.mubr.f32.gmra.mrb[14].mxu0 %v2531_v31 }
 0x7d4   : > { %v2535_v34 = vpop.eup %2534  ;;  %v1481_v35 = vmul.f32 1.442695, %v1429_v5  ;;  %v1483_v50 = vmul.f32 1.442695, %v1430_v24  ;;  %1524 = vadd.xlane.f32.xlu1 %v1523_v49 }
 0x7d5   : > { %v2537_v26 = vpop.eup %2536  ;;  %v1396_v27 = vpop.xlane.xlu1 %1395 }
 0x7d6   : > { %2546 = vpow2.f32 %v1481_v35  ;;  %v1431_v28 = vsub.f32 %v3265_v40, %v1396_v27  ;;  %v1432_v52 = vsub.f32 %v3267_v41, %v1396_v27  ;;  %1716 = vmatprep.mubr.f32.mxu0 %v2537_v26  ;;  %v1526_v53 = vadd.f32 %v2537_v26, %v2535_v34 }
 0x7d7   : > { %2548 = vpow2.f32 %v1483_v50  ;;  %1717 = vmatmul.mubr.f32.gmra.mrb[16].mxu0 %v2535_v34 }
 0x7d8   : > { %v2539_v37 = vpop.eup %2538  ;;  %v1485_v38 = vmul.f32 1.442695, %v1431_v28  ;;  %v1487_v29 = vmul.f32 1.442695, %v1432_v52  ;;  %1527 = vadd.xlane.f32.xlu1 %v1526_v53 }
 0x7d9   : > { %v2541_v30 = vpop.eup %2540  ;;  %v1399_v33 = vpop.xlane.xlu1 %1398 }
 0x7da   : > { %2550 = vpow2.f32 %v1485_v38  ;;  %v1433_v36 = vsub.f32 %v3271_v43, %v1399_v33  ;;  %v1434_v55 = vsub.f32 %v3273_v44, %v1399_v33  ;;  %1721 = vmatprep.mubr.f32.mxu0 %v2541_v30  ;;  %v1529_v58 = vadd.f32 %v2541_v30, %v2539_v37 }
 0x7db   : > { %2552 = vpow2.f32 %v1487_v29  ;;  %1722 = vmatmul.mubr.f32.gmra.mrb[18].mxu0 %v2539_v37 }
 0x7dc   : > { %v2543_v40 = vpop.eup %2542  ;;  %v1489_v41 = vmul.f32 1.442695, %v1433_v36  ;;  %v1491_v39 = vmul.f32 1.442695, %v1434_v55  ;;  %1530 = vadd.xlane.f32.xlu1 %v1529_v58 }
 0x7dd   : > { %v2545_v42 = vpop.eup %2544  ;;  %v1402_v45 = vpop.xlane.xlu1 %1401 }
 0x7de   : > { %2554 = vpow2.f32 %v1489_v41  ;;  %v1435_v48 = vsub.f32 %v3277_v0, %v1402_v45  ;;  %v1436_v56 = vsub.f32 %v3279_v3, %v1402_v45  ;;  %1726 = vmatprep.mubr.f32.mxu0 %v2545_v42  ;;  %v1532_v60 = vadd.f32 %v2545_v42, %v2543_v40  ;;  %v1816_v45 = vld [vmem:[%s3423_s5] sm:$0xff] }
 0x7df   : > { %2556 = vpow2.f32 %v1491_v39  ;;  %1727 = vmatmul.mubr.f32.gmra.mrb[20].mxu0 %v2543_v40 }
 0x7e0   : > { %v2547_v43 = vpop.eup %2546  ;;  %v1493_v44 = vmul.f32 1.442695, %v1435_v48  ;;  %v1495_v4 = vmul.f32 1.442695, %v1436_v56  ;;  %1533 = vadd.xlane.f32.xlu1 %v1532_v60 }
 0x7e1   : > { %v2549_v8 = vpop.eup %2548  ;;  %v1405_v61 = vpop.xlane.xlu1 %1404 }
 0x7e2   : > { %2558 = vpow2.f32 %v1493_v44  ;;  %v1437_v62 = vsub.f32 %v3283_v51, %v1405_v61  ;;  %v1438_v63 = vsub.f32 %v3285_v54, %v1405_v61  ;;  %1731 = vmatprep.mubr.f32.mxu0 %v2549_v8  ;;  %v1535_v6 = vadd.f32 %v2549_v8, %v2547_v43 }
 0x7e3   : > { %2560 = vpow2.f32 %v1495_v4  ;;  %1732 = vmatmul.mubr.f32.gmra.mrb[22].mxu0 %v2547_v43  ;;  %v1818_v43 = vld [vmem:[%s3424_s6] sm:$0xff]  ;;  %v2796_v61 = vmov 0  }
 0x7e4   : > { %v2551_v0 = vpop.eup %2550  ;;  %v1497_v3 = vmul.f32 1.442695, %v1437_v62  ;;  %v1499_v7 = vmul.f32 1.442695, %v1438_v63  ;;  %1536 = vadd.xlane.f32.xlu1 %v1535_v6  ;;  %2505 = vset.pattern.permute.xlu0 %v2796_v61  ;;  %v1819_v6 = vld [vmem:[%s3424_s6 + $0x8] sm:$0xff]  ;;  %v1813_v61 = vld [vmem:[%s1811_s15 + $0x10] sm:$0xff] }
 0x7e5   : > { %v2553_v9 = vpop.eup %2552  ;;  %v1408_v14 = vpop.xlane.xlu1 %1407 }
 0x7e6   : > { %2562 = vpow2.f32 %v1497_v3  ;;  %v1439_v17 = vsub.f32 %v3289_v57, %v1408_v14  ;;  %v1440_v10 = vsub.f32 %v3291_v59, %v1408_v14  ;;  %1736 = vmatprep.mubr.f32.mxu0 %v2553_v9  ;;  %v1538_v11 = vadd.f32 %v2553_v9, %v2551_v0 }
 0x7e7   : > { %2564 = vpow2.f32 %v1499_v7  ;;  %1737 = vmatmul.mubr.f32.gmra.mrb[24].mxu0 %v2551_v0 }
 0x7e8   : > { %v2555_v51 = vpop.eup %2554  ;;  %v1501_v54 = vmul.f32 1.442695, %v1439_v17  ;;  %v1503_v12 = vmul.f32 1.442695, %v1440_v10  ;;  %1539 = vadd.xlane.f32.xlu1 %v1538_v11 }
 0x7e9   : > { %v2557_v13 = vpop.eup %2556 }
 0x7ea   : > { %2566 = vpow2.f32 %v1501_v54  ;;  %1741 = vmatprep.mubr.f32.mxu0 %v2557_v13  ;;  %v1541_v15 = vadd.f32 %v2557_v13, %v2555_v51 }
 0x7eb   : > { %2568 = vpow2.f32 %v1503_v12  ;;  %1742 = vmatmul.mubr.f32.gmra.mrb[26].mxu0 %v2555_v51 }
 0x7ec   : > { %v2559_v16 = vpop.eup %2558  ;;  %1542 = vadd.xlane.f32.xlu1 %v1541_v15 }
 0x7ed   : > { %v2561_v23 = vpop.eup %2560 }
 0x7ee   : > { %1746 = vmatprep.mubr.f32.mxu1 %v2561_v23  ;;  %v1544_v57 = vadd.f32 %v2561_v23, %v2559_v16 }
 0x7ef   : > { %1747 = vmatmul.mubr.f32.vlgmr.msra.gmra.mrb[32].mxu1 %v2559_v16 }
 0x7f0   : > { %v2563_v59 = vpop.eup %2562  ;;  %1545 = vadd.xlane.f32.xlu0 %v1544_v57 }
 0x7f1   : > { %v2565_v25 = vpop.eup %2564 }
 0x7f2   : > { %1751 = vmatprep.mubr.f32.mxu1 %v2565_v25  ;;  %v1547_v18 = vadd.f32 %v2565_v25, %v2563_v59 }
 0x7f3   : > { %1752 = vmatmul.mubr.f32.gmra.mrb[34].mxu1 %v2563_v59 }
 0x7f4   : > { %v2567_v2 = vpop.eup %2566  ;;  %1548 = vadd.xlane.f32.xlu1 %v1547_v18 }
 0x7f5   : > { %v2569_v1 = vpop.eup %2568 }
 0x7f6   : > { %1756 = vmatprep.mubr.f32.mxu1 %v2569_v1  ;;  %v1550_v19 = vadd.f32 %v2569_v1, %v2567_v2 }
 0x7f7   : > { %1757 = vmatmul.mubr.f32.gmra.mrb[36].mxu1 %v2567_v2 }
 0x7f8   : > { %1551 = vadd.xlane.f32.xlu0 %v1550_v19  ;;  %2296 = vmatprep.mubr.msk.f32.mxu1 %vm1030_vm3, %v1816_v45 }
 0x80e   : > { %1822 = vperm.xlu0 %2505, %v1818_v43  }
 0x812   : > { %1827 = vperm.xlu0 %2505, %v1819_v6  }
 0x849   : > { %v1507_v20 = vpop.xlane.xlu1 %1506 }
 0x84a   : > { %2570 = vrcp.f32 %v1507_v20 }
 0x84d   : > { %v1510_v46 = vpop.xlane.xlu1 %1509 }
 0x84e   : > { %2572 = vrcp.f32 %v1510_v46 }
 0x851   : > { %v1513_v31 = vpop.xlane.xlu1 %1512 }
 0x852   : > { %2574 = vrcp.f32 %v1513_v31 }
 0x854   : > { %v2571_v34 = vpop.eup %2570 }
 0x855   : > { %v1516_v32 = vpop.xlane.xlu1 %1515 }
 0x856   : > { %2576 = vrcp.f32 %v1516_v32 }
 0x858   : > { %v2573_v28 = vpop.eup %2572 }
 0x859   : > { %v1519_v47 = vpop.xlane.xlu1 %1518 }
 0x85a   : > { %2578 = vrcp.f32 %v1519_v47 }
 0x85c   : > { %v2575_v30 = vpop.eup %2574 }
 0x85d   : > { %v1522_v21 = vpop.xlane.xlu1 %1521 }
 0x85e   : > { %2580 = vrcp.f32 %v1522_v21 }
 0x860   : > { %v2577_v41 = vpop.eup %2576 }
 0x861   : > { %v1525_v24 = vpop.xlane.xlu1 %1524 }
 0x862   : > { %2582 = vrcp.f32 %v1525_v24 }
 0x864   : > { %v2579_v60 = vpop.eup %2578 }
 0x865   : > { %v1528_v52 = vpop.xlane.xlu1 %1527 }
 0x866   : > { %2584 = vrcp.f32 %v1528_v52 }
 0x868   : > { %v2581_v0 = vpop.eup %2580 }
 0x869   : > { %v1531_v58 = vpop.xlane.xlu1 %1530 }
 0x86a   : > { %2586 = vrcp.f32 %v1531_v58 }
 0x86c   : > { %v2583_v10 = vpop.eup %2582 }
 0x86d   : > { %v1534_v44 = vpop.xlane.xlu1 %1533 }
 0x86e   : > { %2588 = vrcp.f32 %v1534_v44 }
 0x870   : > { %v2585_v13 = vpop.eup %2584 }
 0x871   : > { %v1537_v14 = vpop.xlane.xlu1 %1536 }
 0x872   : > { %2590 = vrcp.f32 %v1537_v14 }
 0x874   : > { %v2587_v25 = vpop.eup %2586 }
 0x875   : > { %v1540_v15 = vpop.xlane.xlu1 %1539 }
 0x876   : > { %2592 = vrcp.f32 %v1540_v15 }
 0x878   : > { %v2589_v46 = vpop.eup %2588 }
 0x879   : > { %v1543_v19 = vpop.xlane.xlu1 %1542 }
 0x87a   : > { %2594 = vrcp.f32 %v1543_v19 }
 0x87d   : > { %v1546_v21 = vpop.xlane.xlu0 %1545 }
 0x87e   : > { %2596 = vrcp.f32 %v1546_v21 }
 0x88e   : > { %v2181_v22 = vpop.f32.mrb[2].mxu0 }
 0x88f   : > { %v2182_v5 = vpop.f32.mrb[3].mxu0 }
 0x890   : > { %v2183_v49 = vadd.f32 %v2182_v5, %v2181_v22  ;;  %v2591_v5 = vpop.eup %2590 }
 0x892   : > { %v2184_v35 = vpop.f32.mrb[4].mxu0  ;;  %v1762_v50 = vmul.f32 %v2571_v34, %v2183_v49 }
 0x893   : > { %v2185_v26 = vpop.f32.mrb[5].mxu0 }
 0x894   : > { %v2186_v27 = vadd.f32 %v2185_v26, %v2184_v35  ;;  %1778 = vxpose.xlu1.b32.start [1/16] (narrow) %v1762_v50, 16  ;;  %v1549_v35 = vpop.xlane.xlu1 %1548  ;;  %v2593_v26 = vpop.eup %2592 }
 0x895   : > { %2598 = vrcp.f32 %v1549_v35 }
 0x896   : > { %v1763_v53 = vmul.f32 %v2573_v28, %v2186_v27  ;;  %v2187_v37 = vpop.f32.mrb[6].mxu0 }
 0x897   : > { %v2188_v38 = vpop.f32.mrb[7].mxu0 }
 0x898   : > { %v2189_v29 = vadd.f32 %v2188_v38, %v2187_v37  ;;  %1779 = vxpose.xlu1.b32.cont [2/16] (narrow) %v1763_v53, 16  ;;  %v1552_v53 = vpop.xlane.xlu0 %1551  ;;  %v2595_v38 = vpop.eup %2594 }
 0x899   : > { %2600 = vrcp.f32 %v1552_v53 }
 0x89a   : > { %v1764_v33 = vmul.f32 %v2575_v30, %v2189_v29  ;;  %v2190_v36 = vpop.f32.mrb[8].mxu0 }
 0x89b   : > { %v2191_v55 = vpop.f32.mrb[9].mxu0 }
 0x89c   : > { %v2192_v40 = vadd.f32 %v2191_v55, %v2190_v36  ;;  %1780 = vxpose.xlu1.b32.cont [3/16] (narrow) %v1764_v33, 16  ;;  %v2597_v55 = vpop.eup %2596 }
 0x89e   : > { %v1765_v39 = vmul.f32 %v2577_v41, %v2192_v40  ;;  %v2193_v42 = vpop.f32.mrb[10].mxu0 }
 0x89f   : > { %v2194_v48 = vpop.f32.mrb[11].mxu0 }
 0x8a0   : > { %v2195_v56 = vadd.f32 %v2194_v48, %v2193_v42  ;;  %1781 = vxpose.xlu1.b32.cont [4/16] (narrow) %v1765_v39, 16  ;;  %v2599_v42 = vpop.eup %2598 }
 0x8a2   : > { %v1766_v4 = vmul.f32 %v2579_v60, %v2195_v56  ;;  %v2196_v8 = vpop.f32.mrb[12].mxu0 }
 0x8a3   : > { %v2197_v62 = vpop.f32.mrb[13].mxu0  ;;  %v2601_v43 = vpop.eup %2600 }
 0x8a4   : > { %v2198_v63 = vadd.f32 %v2197_v62, %v2196_v8  ;;  %1782 = vxpose.xlu1.b32.cont [5/16] (narrow) %v1766_v4, 16  ;;  %v1812_v8 = vld [vmem:[%s1811_s15] sm:$0xff]  ;;  %s2666_s15 = scalar_lea.vmem %s2665_s25, 512 }
 0x8a5   : > { %p2668_p10 = scmp.lt.s32.totalorder %s2666_s15, %s2660_s0 }
 0x8a6   : > { %v1767_v3 = vmul.f32 %v2581_v0, %v2198_v63  ;;  %v2199_v7 = vpop.f32.mrb[14].mxu0 }
 0x8a7   : > { %v2200_v9 = vpop.f32.mrb[15].mxu0  ;;  %p2669_p0 = por %p2668_p10, %p2667_p6 }
 0x8a8   : > { %v2201_v17 = vadd.f32 %v2200_v9, %v2199_v7  ;;  %1783 = vxpose.xlu1.b32.cont [6/16] (narrow) %v1767_v3, 16  ;;  %v1817_v3 = vld [vmem:[%s3423_s5 + $0x8] sm:$0xff]  ;;  %v1823_v7 = vpop.permute.xlu0 %1822 }
 0x8a9   : > { %p2670_p8 = pnand %p2669_p0, %p2663_p3 }
 0x8aa   : > { %v1768_v11 = vmul.f32 %v2583_v10, %v2201_v17  ;;  %v2202_v51 = vpop.f32.mrb[16].mxu0 }
 0x8ab   : > { %v2203_v54 = vpop.f32.mrb[17].mxu0 }
 0x8ac   : > { %v2204_v12 = vadd.f32 %v2203_v54, %v2202_v51  ;;  %1784 = vxpose.xlu1.b32.cont [7/16] (narrow) %v1768_v11, 16  ;;  %v1828_v14 = vpop.permute.xlu0 %1827 }
 0x8ae   : > { %v1769_v16 = vmul.f32 %v2585_v13, %v2204_v12  ;;  %v2205_v23 = vpop.f32.mrb[18].mxu0 }
 0x8af   : > { %v2206_v57 = vpop.f32.mrb[19].mxu0 }
 0x8b0   : > { %v2207_v59 = vadd.f32 %v2206_v57, %v2205_v23  ;;  %1785 = vxpose.xlu1.b32.cont [8/16] (narrow) %v1769_v16, 16 }
 0x8b2   : > { %v1770_v18 = vmul.f32 %v2587_v25, %v2207_v59  ;;  %v2208_v2 = vpop.f32.mrb[20].mxu0 }
 0x8b3   : > { %v2209_v1 = vpop.f32.mrb[21].mxu0 }
 0x8b4   : > { %v2210_v20 = vadd.f32 %v2209_v1, %v2208_v2  ;;  %1786 = vxpose.xlu1.b32.cont [9/16] (narrow) %v1770_v18, 16 }
 0x8b6   : > { %v1771_v31 = vmul.f32 %v2589_v46, %v2210_v20  ;;  %v2211_v32 = vpop.f32.mrb[22].mxu0 }
 0x8b7   : > { %v2212_v47 = vpop.f32.mrb[23].mxu0 }
 0x8b8   : > { %v2213_v22 = vadd.f32 %v2212_v47, %v2211_v32  ;;  %1787 = vxpose.xlu1.b32.cont [10/16] (narrow) %v1771_v31, 16 }
 0x8ba   : > { %v1772_v24 = vmul.f32 %v2591_v5, %v2213_v22  ;;  %v2214_v49 = vpop.f32.mrb[24].mxu0 }
 0x8bb   : > { %v2215_v34 = vpop.f32.mrb[25].mxu0 }
 0x8bc   : > { %v2216_v50 = vadd.f32 %v2215_v34, %v2214_v49  ;;  %1788 = vxpose.xlu1.b32.cont [11/16] (narrow) %v1772_v24, 16 }
 0x8be   : > { %v1773_v27 = vmul.f32 %v2593_v26, %v2216_v50  ;;  %v2217_v28 = vpop.f32.mrb[26].mxu0 }
 0x8bf   : > { %v2218_v52 = vpop.f32.mrb[27].mxu0 }
 0x8c0   : > { %v2219_v37 = vadd.f32 %v2218_v52, %v2217_v28  ;;  %1789 = vxpose.xlu1.b32.cont [12/16] (narrow) %v1773_v27, 16 }
 0x8c2   : > { %v1774_v29 = vmul.f32 %v2595_v38, %v2219_v37  ;;  %v2220_v30 = vpop.f32.mrb[32].mxu1 }
 0x8c3   : > { %v2221_v33 = vpop.f32.mrb[33].mxu1 }
 0x8c4   : > { %v2222_v36 = vadd.f32 %v2221_v33, %v2220_v30  ;;  %1790 = vxpose.xlu1.b32.cont [13/16] (narrow) %v1774_v29, 16 }
 0x8c6   : > { %v1775_v58 = vmul.f32 %v2597_v55, %v2222_v36  ;;  %v2223_v40 = vpop.f32.mrb[34].mxu1 }
 0x8c7   : > { %v2224_v41 = vpop.f32.mrb[35].mxu1 }
 0x8c8   : > { %v2225_v39 = vadd.f32 %v2224_v41, %v2223_v40  ;;  %1791 = vxpose.xlu1.b32.cont [14/16] (narrow) %v1775_v58, 16 }
 0x8ca   : > { %v1776_v45 = vmul.f32 %v2599_v42, %v2225_v39  ;;  %v2226_v48 = vpop.f32.mrb[36].mxu1 }
 0x8cb   : > { %v2227_v56 = vpop.f32.mrb[37].mxu1 }
 0x8cc   : > { %v2228_v60 = vadd.f32 %v2227_v56, %v2226_v48  ;;  %1792 = vxpose.xlu1.b32.cont [15/16] (narrow) %v1776_v45, 16 }
 0x8ce   : > { %v1777_v44 = vmul.f32 %v2601_v43, %v2228_v60 }
 0x8d0   : > { %1793 = vxpose.xlu1.b32.end [16/16] (narrow) %v1777_v44, 16 }
 0x914   : > { %v1794_v4 = vpop.trf.xlu1 }
 0x915   : > { %v1814_v63 = vadd.f32 %v1812_v8, %v1794_v4 }
 0x918   : > { %v1795_v62 = vpop.trf.xlu1 }
 0x919   : > { %v1815_v6 = vadd.f32 %v1813_v61, %v1795_v62 }
 0x91b   : > { %v2352_v0 = vpack.c.bf16 %v1815_v6, %v1814_v63 }
 0x91d   : > { %2353 = vmatprep.subr.bf16.mxu1 %v2352_v0 }
 0x91e   : > { %2355 = vmatpush3.bf16.msra.mxu1 %v2352_v0 }
 0x921   : > { %2297 = vmatmul.mubr.msk.f32.vlgmr.msra.gmra.mrb[38].mxu1 %vm1030_vm3, %v1817_v3 }
 0x9f4   : > { %v2298_v9 = vpop.f32.mrb[38].mxu1 }
 0x9f5   : > { %v1908_v17 = vadd.f32 %v2298_v9, %v1828_v14  ;;  %v1902_v10 = vpop.f32.mrb[39].mxu1 }
 0x9f6   : > { %v1903_v11 = vadd.f32 %v1902_v10, %v1823_v7 }
 0x9f7   : > { %v1912_v51 = vmax.f32 %v1908_v17, 0.0 }
 0x9f8   : > { %v1911_v54 = vmax.f32 %v1903_v11, 0.0 }
 0x9f9   : > { %1914 = vst [vmem:[%s3040_s21 + $0x8] sm:$0xff] %v1912_v51 }
 0x9fa   : > { %1913 = vst [vmem:[%s3040_s21] sm:$0xff] %v1911_v54 }
 0x9fb   : > { %2673 = shalt.err (!%p2670_p8)
}
 0x9fc   : > { %s2674_s12 = scalar_lea.hbm %s3349_s16, 256  ;;  %s2678_s24 = scalar_lea.hbm %s3464_s19, 1024 }
 0x9fd   : > { %p2675_p11 = scmp.ne.s32.totalorder %s3349_s16, %s2674_s12  ;;  %p2679_p9 = scmp.lt.u32.totalorder %s3349_s16, %s3464_s19 }
 0x9fe   : > { %p2680_p1 = scmp.lt.u32.totalorder %s2678_s24, %s2674_s12  ;;  %p2682_p4 = scmp.lt.u32.totalorder %s2674_s12, %s3349_s16 }
 0x9ff   : > { %p2676_p13 = pnand %p2675_p11, %p3465_p2 }
 0xa00   : > { %p2681_p5 = por %p2680_p1, %p2679_p9 }
 0xa01   : > { %p2677_p7 = pneg %p2676_p13 }
 0xa02   : > { %p2683_p12 = por %p2682_p4, %p2681_p5 }
 0xa04   : > { %p2684_p3 = pnand %p2683_p12, %p2677_p7 }
 0xa06   : > { %2687 = shalt.err (!%p2684_p3)
}
 0xa07   : > { %s2798_s3 = smov 128   ;;  %s2799_s17 = smov 256  }
 0xa08   : > { %s2800_s13 = smov 8  }
 0xa09   : > { %2380 = dma.vmem_to_hbm [thread:$0]  (%p3465_p2), %s3351_s26, 256, %s3349_s16, %s3357_s9, %s2798_s3, %s2799_s17, %s2800_s13  }
 0xa0a PF: > { %s3466_s0 = sld [smem:[#allocation18_spill]]  ;;  %s3467_s18 = sld [smem:[#allocation16_spill]] }
 0xa0b   : > { %s3468_s25 = sld [smem:[#allocation20_spill]] }
 0xa10   : > { %p2397_p6 = scmp.ge.s32.totalorder %s3466_s0, 2  ;;  %s1945_s15 = sand.u32 1, %s3467_s18  }
 0xa11   : > { %p3469_p10 = scmp.ne.s32.totalorder %s3468_s25, 0  ;;  %s1946_s12 = scalar_lea.sflag [#allocation9], %s1945_s15 }
 0xa13   : > { %p2391_p0 = pnand %p2397_p6, %p3469_p10 }
 0xa15   : > { %2741 = dma.done.wait (!%p2391_p0), %s1946_s12, 256  }
 0xa16   : > { %2743 = vsyncadd (!%p2391_p0), %s1946_s12, 4294967040  ;;  %s25_s12 = sadd.s32 1, %s3466_s0   ;;  %s3470_s9 = sld [smem:[#allocation17_spill]] }
 0xa17   : > { %p22_p8 = scmp.ge.s32.totalorder %s25_s12, 6   ;;  %s3471_s7 = sld [smem:[#allocation21_spill]] }
 0xa18   : > { %s3472_s26 = smov %s2750_s27  ;;  %s3473_s27 = smov %s2754_s28 }
 0xa19   : > { %s3474_s28 = smov %s2994_s10  ;;  %s3475_s29 = smov %s2762_s30 }
 0xa1a   : > { %s3476_s30 = smov %s2766_s8  ;;  %s3477_s8 = smov %s2991_s23 }
 0xa1b   : > { %s3478_s0 = smov %s2782_s11  ;;  %s3480_s11 = smov %s3486_s20 }
 0xa1c   :  { %24 = sbr.rel (!%p22_p8) target bundleno = 14 (0xe), region = 99 }
 0xa1d   : > { %s3479_s10 = smov %s3471_s7 }
 0xa23   :  { %1951 = vsyncpa [#allocation8], 1 }
 0xa24   :  { %1953 = vsyncpa [#allocation8 + $0x1], 1 }
 0xa25   :  { %1954 = vsyncpa [#allocation11], 1 }
 0xa26   :  { %1955 = vsyncpa [#allocation9], 1 }
 0xa27   :  { %1957 = vsyncpa [#allocation9 + $0x1], 1 }

</bundles_post_ra>
